<compile_context>
chip_gen: v6e
topology: v6e:2x2x1
jax: 0.10.0
libtpu: 0.0.40
codegen_flags: <defaults>
</compile_context>

<pallas_src>
import functools

import jax
import jax.numpy as jnp
from jax.experimental import pallas as pl
from jax.experimental.pallas import tpu as pltpu


LN_EPS = 1e-5          # torch.nn.LayerNorm default
NEG_SLOPE = 0.2        # GATv2Conv default negative_slope

# Row layout inside the packed per-layer (8, C) vector block.
_ROW_BL, _ROW_BR, _ROW_ATT, _ROW_BIAS, _ROW_GAMMA, _ROW_BETA = 0, 1, 2, 3, 4, 5


def _graph_encoder_kernel(x_ref, adj_ref, w_ref, vec_ref, o_ref):
    """All GATv2 layers fused: [GATv2Conv(heads=1) -> LayerNorm -> ReLU] x L.

    Shapes (all resident in VMEM):
      x:   (N, F)        node features
      adj: (N, N)        adj[i, j] = 1 iff message edge j -> i (incl. self-loop)
      w:   (L, F, 2C)    per layer: [W_l | W_r] concatenated on the lane axis
      vec: (L, 8, C)     per layer rows: bl, br, att, bias, gamma, beta, pad, pad
      out: (N, C)
    """
    h = x_ref[...].astype(jnp.float32)

    # Adjacency mask: computed once, reused across layers and across the two
    # masked selects of the softmax.
    mask = adj_ref[...] > 0
    neg_big = jnp.float32(-1e30)

    n_layers = w_ref.shape[0]
    for layer in range(n_layers):                       # unrolled (L is small)
        w = w_ref[layer]                                # (F, 2C)
        vecs = vec_ref[layer]                           # (8, C)
        bl = vecs[_ROW_BL:_ROW_BL + 1, :]
        br = vecs[_ROW_BR:_ROW_BR + 1, :]
        att = vecs[_ROW_ATT:_ROW_ATT + 1, :]
        bias = vecs[_ROW_BIAS:_ROW_BIAS + 1, :]
        gamma = vecs[_ROW_GAMMA:_ROW_GAMMA + 1, :]
        beta = vecs[_ROW_BETA:_ROW_BETA + 1, :]

        # Fused lin_l / lin_r projection: one MXU matmul for both.
        proj = jnp.dot(h, w, preferred_element_type=jnp.float32)   # (N, 2C)
        c = proj.shape[1] // 2
        xl = proj[:, :c] + bl                                       # (N, C)
        xr = proj[:, c:] + br                                       # (N, C)

        # GATv2 attention logits over (target i, source j): LeakyReLU(xl[j]+xr[i]).
        e = xl[None, :, :] + xr[:, None, :]                         # (N, N, C)
        e = jnp.where(e > 0, e, NEG_SLOPE * e)                      # LeakyReLU(0.2)
        logits = jnp.sum(e * att[None, :, :], axis=-1)              # (N, N)

        # Masked softmax over incoming edges of each target node. Every row has
        # a self-loop, so the -1e30 sentinel never dominates the whole row.
        logits = jnp.where(mask, logits, neg_big)
        m = jnp.max(logits, axis=1, keepdims=True)
        p = jnp.where(mask, jnp.exp(logits - m), 0.0)
        denom = jnp.sum(p, axis=1, keepdims=True)
        alpha = p * pl.reciprocal(denom, approx=True)               # (N, N)

        # Aggregate messages: out[i] = sum_j alpha[i, j] * xl[j], plus conv bias.
        out = jnp.dot(alpha, xl, preferred_element_type=jnp.float32) + bias

        # LayerNorm (elementwise affine) over the feature dim.
        # var via E[x^2] - mu^2 so the mean/var reductions share one pass.
        mu = jnp.mean(out, axis=-1, keepdims=True)
        msq = jnp.mean(out * out, axis=-1, keepdims=True)
        var = msq - mu * mu
        y = (out - mu) * jax.lax.rsqrt(var + LN_EPS)
        y = y * gamma + beta

        # ReLU activation; Dropout(p=0.0) is identity.
        h = jnp.maximum(y, 0.0)

    o_ref[...] = h.astype(o_ref.dtype)


def graph_encoder(x, adj, weights, vecs):
    """One fused pallas_call for the whole GraphEncoder stack."""
    n = x.shape[0]
    c = vecs.shape[-1]
    vmem = pl.BlockSpec(memory_space=pltpu.MemorySpace.VMEM)
    return pl.pallas_call(
        _graph_encoder_kernel,
        out_shape=jax.ShapeDtypeStruct((n, c), jnp.float32),
        in_specs=[vmem, vmem, vmem, vmem],
        out_specs=vmem,
        compiler_params=pltpu.CompilerParams(
            vmem_limit_bytes=32 * 1024 * 1024),
    )(x, adj, weights, vecs)


def build_adjacency(edge_index, num_nodes):
    """Dense mask A[i, j] = 1 iff message edge j -> i; self-loops re-added."""
    src = edge_index[0]
    dst = edge_index[1]
    adj = jnp.zeros((num_nodes, num_nodes), jnp.float32).at[dst, src].set(1.0)
    eye = jnp.eye(num_nodes, dtype=jnp.float32)
    adj = adj * (1.0 - eye) + eye   # remove_self_loops + add_self_loops
    return adj


def init_layer_params(key, in_dim, out_dim):
    """Packed params for one GATv2Layer: (F, 2C) weight + (8, C) vector block."""
    ks = jax.random.split(key, 6)
    s_in = 1.0 / jnp.sqrt(jnp.float32(in_dim))
    wl = jax.random.normal(ks[0], (in_dim, out_dim), jnp.float32) * s_in
    wr = jax.random.normal(ks[1], (in_dim, out_dim), jnp.float32) * s_in
    bl = jax.random.normal(ks[2], (out_dim,), jnp.float32) * 0.1
    br = jax.random.normal(ks[3], (out_dim,), jnp.float32) * 0.1
    att = jax.random.normal(ks[4], (out_dim,), jnp.float32) * 0.1
    bias = jax.random.normal(ks[5], (out_dim,), jnp.float32) * 0.1
    gamma = jnp.ones((out_dim,), jnp.float32)   # torch LayerNorm default init
    beta = jnp.zeros((out_dim,), jnp.float32)
    pad = jnp.zeros((out_dim,), jnp.float32)
    w = jnp.concatenate([wl, wr], axis=1)                         # (F, 2C)
    vec = jnp.stack([bl, br, att, bias, gamma, beta, pad, pad])   # (8, C)
    return w, vec


@functools.partial(jax.jit, static_argnames=("num_nodes",))
def graph_model_forward(x, edge_index, weights, vecs, num_nodes):
    adj = build_adjacency(edge_index, num_nodes)
    return graph_encoder(x, adj, weights, vecs)


if __name__ == "__main__":
    N = 16            # number of graph nodes
    HIDDEN = 32       # hidden_dim
    N_LAYERS = 2
    HEADS = 1

    key = jax.random.PRNGKey(0)
    kx, ke, k0, k1 = jax.random.split(key, 4)

    # Node features and a small random edge list ([2, E], source row / target row).
    x = jax.random.normal(kx, (N, HIDDEN), jnp.float32)
    E = 40
    edge_index = jax.random.randint(ke, (2, E), 0, N, dtype=jnp.int32)

    # GraphEncoder: layer 0 (in=HIDDEN, concat=True), layer 1 (in=HIDDEN*heads,
    # concat=False). With heads == 1 all layers share the same (F, C) so they
    # stack into single (L, F, 2C) / (L, 8, C) packed tensors.
    w0, v0 = init_layer_params(k0, HIDDEN, HIDDEN * HEADS)
    w1, v1 = init_layer_params(k1, HIDDEN * HEADS, HIDDEN)
    weights = jnp.stack([w0, w1])   # (L, F, 2C)
    vecs = jnp.stack([v0, v1])      # (L, 8, C)

    out = graph_model_forward(x, edge_index, weights, vecs, num_nodes=N)
    out = jax.block_until_ready(out)
    assert out.shape == (N, HIDDEN), out.shape
    assert bool(jnp.all(jnp.isfinite(out)))
    print("KERNEL_OK")
</pallas_src>

<mosaic_0001>
module attributes {stable_mosaic.version = 11 : i64} {
  func.func @_graph_encoder_kernel(%arg0: memref<16x32xf32, #tpu.memory_space<vmem>>, %arg1: memref<16x16xf32, #tpu.memory_space<vmem>>, %arg2: memref<2x32x64xf32, #tpu.memory_space<vmem>>, %arg3: memref<2x8x32xf32, #tpu.memory_space<vmem>>, %arg4: memref<16x32xf32, #tpu.memory_space<vmem>>) attributes {dimension_semantics = [], scalar_prefetch = 0 : i64, scratch_operands = 0 : i64, tpu.core_type = #tpu.core_type<tc>} {
    %c0 = arith.constant 0 : index
    %c0_0 = arith.constant 0 : index
    %0 = vector.load %arg0[%c0, %c0_0] : memref<16x32xf32, #tpu.memory_space<vmem>>, vector<16x32xf32>
    %c0_1 = arith.constant 0 : index
    %c0_2 = arith.constant 0 : index
    %1 = vector.load %arg1[%c0_1, %c0_2] : memref<16x16xf32, #tpu.memory_space<vmem>>, vector<16x16xf32>
    %cst = arith.constant 0.000000e+00 : f32
    %2 = vector.broadcast %cst : f32 to vector<16x16xf32>
    %3 = arith.cmpf ogt, %1, %2 : vector<16x16xf32>
    %c0_3 = arith.constant 0 : index
    %c0_4 = arith.constant 0 : index
    %c0_5 = arith.constant 0 : index
    %4 = vector.load %arg2[%c0_3, %c0_4, %c0_5] : memref<2x32x64xf32, #tpu.memory_space<vmem>>, vector<1x32x64xf32>
    %5 = vector.shape_cast %4 : vector<1x32x64xf32> to vector<32x64xf32>
    %c0_6 = arith.constant 0 : index
    %c0_7 = arith.constant 0 : index
    %c0_8 = arith.constant 0 : index
    %6 = vector.load %arg3[%c0_6, %c0_7, %c0_8] : memref<2x8x32xf32, #tpu.memory_space<vmem>>, vector<1x8x32xf32>
    %7 = vector.shape_cast %6 : vector<1x8x32xf32> to vector<8x32xf32>
    %8 = vector.extract_strided_slice %7 {offsets = [0, 0], sizes = [1, 32], strides = [1, 1]} : vector<8x32xf32> to vector<1x32xf32>
    %9 = vector.extract_strided_slice %7 {offsets = [1, 0], sizes = [1, 32], strides = [1, 1]} : vector<8x32xf32> to vector<1x32xf32>
    %10 = vector.extract_strided_slice %7 {offsets = [2, 0], sizes = [1, 32], strides = [1, 1]} : vector<8x32xf32> to vector<1x32xf32>
    %11 = vector.extract_strided_slice %7 {offsets = [3, 0], sizes = [1, 32], strides = [1, 1]} : vector<8x32xf32> to vector<1x32xf32>
    %12 = vector.extract_strided_slice %7 {offsets = [4, 0], sizes = [1, 32], strides = [1, 1]} : vector<8x32xf32> to vector<1x32xf32>
    %13 = vector.extract_strided_slice %7 {offsets = [5, 0], sizes = [1, 32], strides = [1, 1]} : vector<8x32xf32> to vector<1x32xf32>
    %cst_9 = arith.constant dense<0.000000e+00> : vector<16x64xf32>
    %14 = tpu.matmul %0, %5, %cst_9 {dimension_numbers = #tpu.dot_dimension_numbers<[1], [0], [0], [1], [0, 0, 1, 1], [], []>} : vector<16x32xf32>, vector<32x64xf32>, vector<16x64xf32> -> vector<16x64xf32>
    %15 = vector.extract_strided_slice %14 {offsets = [0, 0], sizes = [16, 32], strides = [1, 1]} : vector<16x64xf32> to vector<16x32xf32>
    %16 = vector.broadcast %8 : vector<1x32xf32> to vector<16x32xf32>
    %17 = arith.addf %15, %16 : vector<16x32xf32>
    %18 = vector.extract_strided_slice %14 {offsets = [0, 32], sizes = [16, 32], strides = [1, 1]} : vector<16x64xf32> to vector<16x32xf32>
    %19 = vector.broadcast %9 : vector<1x32xf32> to vector<16x32xf32>
    %20 = arith.addf %18, %19 : vector<16x32xf32>
    %21 = vector.shape_cast %17 : vector<16x32xf32> to vector<1x16x32xf32>
    %22 = vector.shape_cast %20 : vector<16x32xf32> to vector<16x1x32xf32>
    %23 = vector.broadcast %21 : vector<1x16x32xf32> to vector<16x16x32xf32>
    %24 = vector.broadcast %22 : vector<16x1x32xf32> to vector<16x16x32xf32>
    %25 = arith.addf %23, %24 : vector<16x16x32xf32>
    %cst_10 = arith.constant 0.000000e+00 : f32
    %26 = vector.broadcast %cst_10 : f32 to vector<16x16x32xf32>
    %27 = arith.cmpf ogt, %25, %26 : vector<16x16x32xf32>
    %cst_11 = arith.constant 2.000000e-01 : f32
    %28 = vector.broadcast %cst_11 : f32 to vector<16x16x32xf32>
    %29 = arith.mulf %28, %25 : vector<16x16x32xf32>
    %30 = arith.select %27, %25, %29 : vector<16x16x32xi1>, vector<16x16x32xf32>
    %31 = vector.shape_cast %10 : vector<1x32xf32> to vector<1x1x32xf32>
    %32 = vector.broadcast %31 : vector<1x1x32xf32> to vector<16x16x32xf32>
    %33 = arith.mulf %30, %32 : vector<16x16x32xf32>
    %cst_12 = arith.constant dense<0.000000e+00> : vector<16x16xf32>
    %34 = vector.multi_reduction <add>, %33, %cst_12 [2] : vector<16x16x32xf32> to vector<16x16xf32>
    %cst_13 = arith.constant -1.000000e+30 : f32
    %35 = vector.broadcast %cst_13 : f32 to vector<16x16xf32>
    %36 = arith.select %3, %34, %35 : vector<16x16xi1>, vector<16x16xf32>
    %cst_14 = arith.constant dense<0xFF800000> : vector<16xf32>
    %37 = vector.multi_reduction <maximumf>, %36, %cst_14 [1] : vector<16x16xf32> to vector<16xf32>
    %38 = vector.shape_cast %37 : vector<16xf32> to vector<16x1xf32>
    %39 = vector.broadcast %38 : vector<16x1xf32> to vector<16x16xf32>
    %40 = arith.subf %36, %39 : vector<16x16xf32>
    %41 = math.exp %40 : vector<16x16xf32>
    %cst_15 = arith.constant 0.000000e+00 : f32
    %42 = vector.broadcast %cst_15 : f32 to vector<16x16xf32>
    %43 = arith.select %3, %41, %42 : vector<16x16xi1>, vector<16x16xf32>
    %cst_16 = arith.constant dense<0.000000e+00> : vector<16xf32>
    %44 = vector.multi_reduction <add>, %43, %cst_16 [1] : vector<16x16xf32> to vector<16xf32>
    %45 = vector.shape_cast %44 : vector<16xf32> to vector<16x1xf32>
    %46 = tpu.reciprocal %45 {approx = true} : vector<16x1xf32> -> vector<16x1xf32>
    %47 = vector.broadcast %46 : vector<16x1xf32> to vector<16x16xf32>
    %48 = arith.mulf %43, %47 : vector<16x16xf32>
    %cst_17 = arith.constant dense<0.000000e+00> : vector<16x32xf32>
    %49 = tpu.matmul %48, %17, %cst_17 {dimension_numbers = #tpu.dot_dimension_numbers<[1], [0], [0], [1], [0, 0, 1, 1], [], []>} : vector<16x16xf32>, vector<16x32xf32>, vector<16x32xf32> -> vector<16x32xf32>
    %50 = vector.broadcast %11 : vector<1x32xf32> to vector<16x32xf32>
    %51 = arith.addf %49, %50 : vector<16x32xf32>
    %cst_18 = arith.constant dense<0.000000e+00> : vector<16xf32>
    %52 = vector.multi_reduction <add>, %51, %cst_18 [1] : vector<16x32xf32> to vector<16xf32>
    %53 = vector.shape_cast %52 : vector<16xf32> to vector<16x1xf32>
    %cst_19 = arith.constant 3.200000e+01 : f32
    %54 = vector.broadcast %cst_19 : f32 to vector<16x1xf32>
    %55 = arith.divf %53, %54 : vector<16x1xf32>
    %56 = arith.mulf %51, %51 : vector<16x32xf32>
    %cst_20 = arith.constant dense<0.000000e+00> : vector<16xf32>
    %57 = vector.multi_reduction <add>, %56, %cst_20 [1] : vector<16x32xf32> to vector<16xf32>
    %58 = vector.shape_cast %57 : vector<16xf32> to vector<16x1xf32>
    %cst_21 = arith.constant 3.200000e+01 : f32
    %59 = vector.broadcast %cst_21 : f32 to vector<16x1xf32>
    %60 = arith.divf %58, %59 : vector<16x1xf32>
    %61 = arith.mulf %55, %55 : vector<16x1xf32>
    %62 = arith.subf %60, %61 : vector<16x1xf32>
    %63 = vector.broadcast %55 : vector<16x1xf32> to vector<16x32xf32>
    %64 = arith.subf %51, %63 : vector<16x32xf32>
    %cst_22 = arith.constant 9.99999974E-6 : f32
    %65 = vector.broadcast %cst_22 : f32 to vector<16x1xf32>
    %66 = arith.addf %62, %65 : vector<16x1xf32>
    %67 = math.rsqrt %66 : vector<16x1xf32>
    %68 = vector.broadcast %67 : vector<16x1xf32> to vector<16x32xf32>
    %69 = arith.mulf %64, %68 : vector<16x32xf32>
    %70 = vector.broadcast %12 : vector<1x32xf32> to vector<16x32xf32>
    %71 = arith.mulf %69, %70 : vector<16x32xf32>
    %72 = vector.broadcast %13 : vector<1x32xf32> to vector<16x32xf32>
    %73 = arith.addf %71, %72 : vector<16x32xf32>
    %cst_23 = arith.constant 0.000000e+00 : f32
    %74 = vector.broadcast %cst_23 : f32 to vector<16x32xf32>
    %75 = arith.maximumf %73, %74 : vector<16x32xf32>
    %c1 = arith.constant 1 : index
    %c0_24 = arith.constant 0 : index
    %c0_25 = arith.constant 0 : index
    %76 = vector.load %arg2[%c1, %c0_24, %c0_25] : memref<2x32x64xf32, #tpu.memory_space<vmem>>, vector<1x32x64xf32>
    %77 = vector.shape_cast %76 : vector<1x32x64xf32> to vector<32x64xf32>
    %c1_26 = arith.constant 1 : index
    %c0_27 = arith.constant 0 : index
    %c0_28 = arith.constant 0 : index
    %78 = vector.load %arg3[%c1_26, %c0_27, %c0_28] : memref<2x8x32xf32, #tpu.memory_space<vmem>>, vector<1x8x32xf32>
    %79 = vector.shape_cast %78 : vector<1x8x32xf32> to vector<8x32xf32>
    %80 = vector.extract_strided_slice %79 {offsets = [0, 0], sizes = [1, 32], strides = [1, 1]} : vector<8x32xf32> to vector<1x32xf32>
    %81 = vector.extract_strided_slice %79 {offsets = [1, 0], sizes = [1, 32], strides = [1, 1]} : vector<8x32xf32> to vector<1x32xf32>
    %82 = vector.extract_strided_slice %79 {offsets = [2, 0], sizes = [1, 32], strides = [1, 1]} : vector<8x32xf32> to vector<1x32xf32>
    %83 = vector.extract_strided_slice %79 {offsets = [3, 0], sizes = [1, 32], strides = [1, 1]} : vector<8x32xf32> to vector<1x32xf32>
    %84 = vector.extract_strided_slice %79 {offsets = [4, 0], sizes = [1, 32], strides = [1, 1]} : vector<8x32xf32> to vector<1x32xf32>
    %85 = vector.extract_strided_slice %79 {offsets = [5, 0], sizes = [1, 32], strides = [1, 1]} : vector<8x32xf32> to vector<1x32xf32>
    %cst_29 = arith.constant dense<0.000000e+00> : vector<16x64xf32>
    %86 = tpu.matmul %75, %77, %cst_29 {dimension_numbers = #tpu.dot_dimension_numbers<[1], [0], [0], [1], [0, 0, 1, 1], [], []>} : vector<16x32xf32>, vector<32x64xf32>, vector<16x64xf32> -> vector<16x64xf32>
    %87 = vector.extract_strided_slice %86 {offsets = [0, 0], sizes = [16, 32], strides = [1, 1]} : vector<16x64xf32> to vector<16x32xf32>
    %88 = vector.broadcast %80 : vector<1x32xf32> to vector<16x32xf32>
    %89 = arith.addf %87, %88 : vector<16x32xf32>
    %90 = vector.extract_strided_slice %86 {offsets = [0, 32], sizes = [16, 32], strides = [1, 1]} : vector<16x64xf32> to vector<16x32xf32>
    %91 = vector.broadcast %81 : vector<1x32xf32> to vector<16x32xf32>
    %92 = arith.addf %90, %91 : vector<16x32xf32>
    %93 = vector.shape_cast %89 : vector<16x32xf32> to vector<1x16x32xf32>
    %94 = vector.shape_cast %92 : vector<16x32xf32> to vector<16x1x32xf32>
    %95 = vector.broadcast %93 : vector<1x16x32xf32> to vector<16x16x32xf32>
    %96 = vector.broadcast %94 : vector<16x1x32xf32> to vector<16x16x32xf32>
    %97 = arith.addf %95, %96 : vector<16x16x32xf32>
    %cst_30 = arith.constant 0.000000e+00 : f32
    %98 = vector.broadcast %cst_30 : f32 to vector<16x16x32xf32>
    %99 = arith.cmpf ogt, %97, %98 : vector<16x16x32xf32>
    %cst_31 = arith.constant 2.000000e-01 : f32
    %100 = vector.broadcast %cst_31 : f32 to vector<16x16x32xf32>
    %101 = arith.mulf %100, %97 : vector<16x16x32xf32>
    %102 = arith.select %99, %97, %101 : vector<16x16x32xi1>, vector<16x16x32xf32>
    %103 = vector.shape_cast %82 : vector<1x32xf32> to vector<1x1x32xf32>
    %104 = vector.broadcast %103 : vector<1x1x32xf32> to vector<16x16x32xf32>
    %105 = arith.mulf %102, %104 : vector<16x16x32xf32>
    %cst_32 = arith.constant dense<0.000000e+00> : vector<16x16xf32>
    %106 = vector.multi_reduction <add>, %105, %cst_32 [2] : vector<16x16x32xf32> to vector<16x16xf32>
    %cst_33 = arith.constant -1.000000e+30 : f32
    %107 = vector.broadcast %cst_33 : f32 to vector<16x16xf32>
    %108 = arith.select %3, %106, %107 : vector<16x16xi1>, vector<16x16xf32>
    %cst_34 = arith.constant dense<0xFF800000> : vector<16xf32>
    %109 = vector.multi_reduction <maximumf>, %108, %cst_34 [1] : vector<16x16xf32> to vector<16xf32>
    %110 = vector.shape_cast %109 : vector<16xf32> to vector<16x1xf32>
    %111 = vector.broadcast %110 : vector<16x1xf32> to vector<16x16xf32>
    %112 = arith.subf %108, %111 : vector<16x16xf32>
    %113 = math.exp %112 : vector<16x16xf32>
    %cst_35 = arith.constant 0.000000e+00 : f32
    %114 = vector.broadcast %cst_35 : f32 to vector<16x16xf32>
    %115 = arith.select %3, %113, %114 : vector<16x16xi1>, vector<16x16xf32>
    %cst_36 = arith.constant dense<0.000000e+00> : vector<16xf32>
    %116 = vector.multi_reduction <add>, %115, %cst_36 [1] : vector<16x16xf32> to vector<16xf32>
    %117 = vector.shape_cast %116 : vector<16xf32> to vector<16x1xf32>
    %118 = tpu.reciprocal %117 {approx = true} : vector<16x1xf32> -> vector<16x1xf32>
    %119 = vector.broadcast %118 : vector<16x1xf32> to vector<16x16xf32>
    %120 = arith.mulf %115, %119 : vector<16x16xf32>
    %cst_37 = arith.constant dense<0.000000e+00> : vector<16x32xf32>
    %121 = tpu.matmul %120, %89, %cst_37 {dimension_numbers = #tpu.dot_dimension_numbers<[1], [0], [0], [1], [0, 0, 1, 1], [], []>} : vector<16x16xf32>, vector<16x32xf32>, vector<16x32xf32> -> vector<16x32xf32>
    %122 = vector.broadcast %83 : vector<1x32xf32> to vector<16x32xf32>
    %123 = arith.addf %121, %122 : vector<16x32xf32>
    %cst_38 = arith.constant dense<0.000000e+00> : vector<16xf32>
    %124 = vector.multi_reduction <add>, %123, %cst_38 [1] : vector<16x32xf32> to vector<16xf32>
    %125 = vector.shape_cast %124 : vector<16xf32> to vector<16x1xf32>
    %cst_39 = arith.constant 3.200000e+01 : f32
    %126 = vector.broadcast %cst_39 : f32 to vector<16x1xf32>
    %127 = arith.divf %125, %126 : vector<16x1xf32>
    %128 = arith.mulf %123, %123 : vector<16x32xf32>
    %cst_40 = arith.constant dense<0.000000e+00> : vector<16xf32>
    %129 = vector.multi_reduction <add>, %128, %cst_40 [1] : vector<16x32xf32> to vector<16xf32>
    %130 = vector.shape_cast %129 : vector<16xf32> to vector<16x1xf32>
    %cst_41 = arith.constant 3.200000e+01 : f32
    %131 = vector.broadcast %cst_41 : f32 to vector<16x1xf32>
    %132 = arith.divf %130, %131 : vector<16x1xf32>
    %133 = arith.mulf %127, %127 : vector<16x1xf32>
    %134 = arith.subf %132, %133 : vector<16x1xf32>
    %135 = vector.broadcast %127 : vector<16x1xf32> to vector<16x32xf32>
    %136 = arith.subf %123, %135 : vector<16x32xf32>
    %cst_42 = arith.constant 9.99999974E-6 : f32
    %137 = vector.broadcast %cst_42 : f32 to vector<16x1xf32>
    %138 = arith.addf %134, %137 : vector<16x1xf32>
    %139 = math.rsqrt %138 : vector<16x1xf32>
    %140 = vector.broadcast %139 : vector<16x1xf32> to vector<16x32xf32>
    %141 = arith.mulf %136, %140 : vector<16x32xf32>
    %142 = vector.broadcast %84 : vector<1x32xf32> to vector<16x32xf32>
    %143 = arith.mulf %141, %142 : vector<16x32xf32>
    %144 = vector.broadcast %85 : vector<1x32xf32> to vector<16x32xf32>
    %145 = arith.addf %143, %144 : vector<16x32xf32>
    %cst_43 = arith.constant 0.000000e+00 : f32
    %146 = vector.broadcast %cst_43 : f32 to vector<16x32xf32>
    %147 = arith.maximumf %145, %146 : vector<16x32xf32>
    %c0_44 = arith.constant 0 : index
    %c0_45 = arith.constant 0 : index
    %148 = vector.load %arg4[%c0_44, %c0_45] : memref<16x32xf32, #tpu.memory_space<vmem>>, vector<16x32xf32>
    tpu.vector_store %arg4[%c0_44, %c0_45], %147 {strides = array<i32>} : memref<16x32xf32, #tpu.memory_space<vmem>>, vector<16x32xf32>,
    return
  }
}

</mosaic_0001>

<bundles_post_ra>
// kernel: graph_model_forward.1
= control target key start
LH: loop header
LB: loop body
LE: loop exit
PB: predicated region body
PF: predicated region fallthrough
CT: control target
= control target key end

     0   :  { %vm29_vm0 = vcmask 261120   ;;  %v111_v2 = vlaneseq  ;;  %s2693_s0 = inlined_call_operand.vmem [shape: f32[16,32], index: 0, kind: input, shape index: {}]   ;;  %s2694_s1 = inlined_call_operand.vmem [shape: f32[16,16], index: 1, kind: input, shape index: {}]   ;;  %s2695_s2 = inlined_call_operand.vmem [shape: f32[2,32,64], index: 2, kind: input, shape index: {}]   ;;  %s2696_s3 = inlined_call_operand.vmem [shape: f32[2,8,32], index: 3, kind: input, shape index: {}]   ;;  %s2697_s4 = inlined_call_operand.hbm [shape: f32[16,32], index: 4, kind: output, shape index: {}]  }
   0x1   :  { %v27_v0 = vld [vmem:[%s2695_s2 + $0x18] sm:$0xff]  ;;  %v26_v1 = vld [vmem:[%s2695_s2 + $0x10] sm:$0xff]  ;;  %v18_v3 = vld [vmem:[%s2693_s0] sm:$0xff] }
   0x2   :  { %1933 = vmatprep.subr.mxu0 %v27_v0  ;;  %v25_v4 = vld [vmem:[%s2695_s2 + $0x8] sm:$0xff]  ;;  %1941 = vmatprep.mubr.msk.f32.mxu0 %vm29_vm0, %v18_v3  ;;  %v2067_v5 = vshrl.u32 %v111_v2, 7 }
   0x3   :  { %1934 = vmatpush3.msra.mxu0 %v27_v0 }
   0x4   :  { %9 = vsyncpa [#allocation3], 0  ;;  %1935 = vmatprep.subr.mxu0 %v26_v1  ;;  %v2072_v6 = vld [vmem:[%s2696_s3] sm:$0xff]  ;;  %v119_v8 = vsub.s32 1, %v2067_v5  ;;  %v19_v9 = vld [vmem:[%s2693_s0 + $0x8] sm:$0xff]  ;;  %s2022_s29 = smov 32  }
   0x5   :  { %1936 = vmatpush3.msra.mxu0 %v26_v1  ;;  %v24_v7 = vld [vmem:[%s2695_s2] sm:$0xff]  ;;  %v2023_v11 = vmov 1966171168   ;;  %v2087_v13 = vsub.s32 0, %v2067_v5  ;;  %s2024_s0 = smov 96   ;;  %v469_v3 = vsub.s32 2, %v2067_v5 }
   0x6   :  { %1937 = vmatprep.subr.mxu0 %v25_v4  ;;  %v120_v10 = vrot.slane %v2072_v6, %v119_v8  ;;  %v131_v12 = vunpack.c.l.s4 %v2023_v11 }
   0x7   :  { %1938 = vmatpush3.msra.mxu0 %v25_v4  ;;  %v114_v15 = vrot.slane %v2072_v6, %v2087_v13 }
   0x8   :  { %1939 = vmatprep.subr.mxu0 %v24_v7  ;;  %122 = vrot.lane.b32.xlu0 %v120_v10, %s2022_s29  ;;  %v132_v14 = vunpack.c.0.s8 %v131_v12  ;;  %v2152_v10 = vrot.slane %v2072_v6, %v469_v3 }
   0x9   :  { %1940 = vmatpush3.msra.mxu0 %v24_v7 }
   0xa   :  { %1942 = vmatmul.mubr.msk.f32.vlgmr.msra.gmra.mxu0 %vm29_vm0, %v19_v9  ;;  %v2092_v17 = vsub.s32 %v132_v14, %v2067_v5 }
  0x7a   :  { %v123_v16 = vpop.permute.xlu0 %122 }
  0xca   :  { %v1943_v18 = vpop.f32.mrf.mxu0 }
  0xcb   :  { %v2094_v19 = vadd.f32 %v1943_v18, %v114_v15  ;;  %v126_v20 = vadd.f32 %v1943_v18, %v123_v16 }
  0xcc   :  { %v102_v21 = vpop.f32.mrf.mxu0 }
  0xcd   :  { %v185_v22 = vrot.slane %v126_v20, %v2092_v17  ;;  %v2097_v23 = vadd.f32 %v114_v15, %v102_v21  ;;  %v125_v24 = vadd.f32 %v123_v16, %v102_v21  ;;  %1944 = vmatprep.subr.mxu1 %v2094_v19  ;;  %v178_v28 = vcombine.high %v126_v20, %v126_v20 }
  0xce   :  { %1945 = vmatpush3.msra.mxu1 %v2094_v19 }
  0xcf   :  { %v201_v25 = vrot.slane %v185_v22, %v2092_v17  ;;  %v129_v26 = vcombine.high %v125_v24, %v125_v24  ;;  %v136_v27 = vrot.slane %v125_v24, %v2092_v17  ;;  %1946 = vmatprep.subr.mxu1 %v2097_v23  ;;  %v193_v29 = vcombine.high %v185_v22, %v185_v22 }
  0xd0   :  { %1947 = vmatpush3.msra.mxu1 %v2097_v23  ;;  %v192_v35 = vrot.slane %v178_v28, %v2092_v17 }
  0xd1   :  { %v143_v30 = vrot.slane %v129_v26, %v2092_v17  ;;  %v144_v31 = vcombine.high %v136_v27, %v136_v27  ;;  %v152_v32 = vrot.slane %v136_v27, %v2092_v17  ;;  %v262_v33 = vrot.slane %v201_v25, %v2087_v13 }
  0xd2   :  { %v215_v34 = vrot.slane %v193_v29, %v2092_v17  ;;  %v223_v37 = vcombine.high %v201_v25, %v201_v25  ;;  %v208_v42 = vrot.slane %v192_v35, %v2092_v17  ;;  %v194_v47 = vcombine.high %v192_v35, %v192_v35 }
  0xd3   :  { %307 = vrot.lane.b32.xlu0 %v262_v33, %s2024_s0  ;;  %v166_v38 = vrot.slane %v144_v31, %v2092_v17  ;;  %v230_v39 = vrot.slane %v152_v32, %v2087_v13  ;;  %v159_v40 = vrot.slane %v143_v30, %v2092_v17  ;;  %v145_v43 = vcombine.high %v143_v30, %v143_v30 }
  0xd4   :  { %v266_v36 = vrot.slane %v215_v34, %v2087_v13  ;;  %v270_v41 = vrot.slane %v223_v37, %v2087_v13  ;;  %v278_v46 = vrot.slane %v208_v42, %v2087_v13  ;;  %v174_v51 = vcombine.high %v152_v32, %v152_v32 }
  0xd5   :  { %v246_v44 = vrot.slane %v159_v40, %v2087_v13  ;;  %v176_v45 = vcombine.high %v166_v38, %v166_v38  ;;  %v173_v49 = vrot.slane %v145_v43, %v2092_v17  ;;  %v234_v50 = vrot.slane %v166_v38, %v2087_v13 }
  0xd6   :  { %309 = vrot.lane.b32.xlu1 %v266_v36, %s2024_s0  ;;  %v175_v53 = vcombine.high %v159_v40, %v159_v40  ;;  %v222_v54 = vrot.slane %v194_v47, %v2092_v17  ;;  %v225_v55 = vcombine.high %v215_v34, %v215_v34  ;;  %v238_v56 = vrot.slane %v174_v51, %v2087_v13 }
  0xd7   :  { %291 = vrot.lane.b32.xlu0 %v230_v39, %s2024_s0  ;;  %v242_v48 = vrot.slane %v176_v45, %v2087_v13  ;;  %v250_v52 = vrot.slane %v173_v49, %v2087_v13  ;;  %v177_v61 = vcombine.high %v173_v49, %v173_v49  ;;  %v224_v63 = vcombine.high %v208_v42, %v208_v42 }
  0xd8   :  { %v254_v57 = vrot.slane %v175_v53, %v2087_v13  ;;  %v226_v58 = vcombine.high %v222_v54, %v222_v54  ;;  %v274_v59 = vrot.slane %v225_v55, %v2087_v13  ;;  %v282_v62 = vrot.slane %v222_v54, %v2087_v13 }
  0xd9   :  { %v258_v0 = vrot.slane %v177_v61, %v2087_v13  ;;  %v286_v1 = vrot.slane %v224_v63, %v2087_v13 }
  0xda   :  { %311 = vrot.lane.b32.xlu1 %v270_v41, %s2024_s0  ;;  %v290_v60 = vrot.slane %v226_v58, %v2087_v13 }
  0xdb   :  { %299 = vrot.lane.b32.xlu0 %v246_v44, %s2024_s0 }
  0xde   :  { %315 = vrot.lane.b32.xlu1 %v278_v46, %s2024_s0 }
  0xdf   :  { %297 = vrot.lane.b32.xlu0 %v242_v48, %s2024_s0 }
  0xe2   :  { %293 = vrot.lane.b32.xlu1 %v234_v50, %s2024_s0 }
  0xe3   :  { %301 = vrot.lane.b32.xlu0 %v250_v52, %s2024_s0 }
  0xe6   :  { %295 = vrot.lane.b32.xlu1 %v238_v56, %s2024_s0 }
  0xe7   :  { %303 = vrot.lane.b32.xlu0 %v254_v57, %s2024_s0 }
  0xea   :  { %313 = vrot.lane.b32.xlu1 %v274_v59, %s2024_s0 }
  0xeb   :  { %321 = vrot.lane.b32.xlu0 %v290_v60, %s2024_s0 }
  0xee   :  { %317 = vrot.lane.b32.xlu1 %v282_v62, %s2024_s0 }
  0xef   :  { %305 = vrot.lane.b32.xlu0 %v258_v0, %s2024_s0 }
  0xf2   :  { %319 = vrot.lane.b32.xlu1 %v286_v1, %s2024_s0 }
 0x145   :  { %v308_v4 = vpop.permute.xlu0 %307 }
 0x146   :  { %v355_v7 = vadd.f32 %v308_v4, %v2097_v23  ;;  %v356_v9 = vadd.f32 %v308_v4, %v2094_v19 }
 0x148   :  { %v310_v11 = vpop.permute.xlu1 %309  ;;  %vm388_vm1 = vcmp.gt.f32.partialorder %v356_v9, 0.0  ;;  %v420_v14 = vmul.f32 0.2, %v356_v9  ;;  %vm387_vm2 = vcmp.gt.f32.partialorder %v355_v7, 0.0  ;;  %v419_v16 = vmul.f32 0.2, %v355_v7 }
 0x149   :  { %v357_v12 = vadd.f32 %v310_v11, %v2097_v23  ;;  %v292_v15 = vpop.permute.xlu0 %291  ;;  %v358_v18 = vadd.f32 %v310_v11, %v2094_v19 }
 0x14a   :  { %v339_v20 = vadd.f32 %v292_v15, %v2097_v23  ;;  %v340_v21 = vadd.f32 %v292_v15, %v2094_v19  ;;  %v452_v22 = vsel %vm388_vm1, %v356_v9, %v420_v14  ;;  %v451_v26 = vsel %vm387_vm2, %v355_v7, %v419_v16 }
 0x14b   :  { %v488_v25 = vmul.f32 %v2152_v10, %v452_v22  ;;  %vm389_vm3 = vcmp.gt.f32.partialorder %v357_v12, 0.0  ;;  %v421_v27 = vmul.f32 0.2, %v357_v12  ;;  %v487_v29 = vmul.f32 %v2152_v10, %v451_v26 }
 0x14c   :  { %v312_v24 = vpop.permute.xlu1 %311  ;;  %vm372_vm4 = vcmp.gt.f32.partialorder %v340_v21, 0.0  ;;  %v404_v31 = vmul.f32 0.2, %v340_v21  ;;  %vm371_vm5 = vcmp.gt.f32.partialorder %v339_v20, 0.0  ;;  %v403_v32 = vmul.f32 0.2, %v339_v20 }
 0x14d   :  { %v359_v28 = vadd.f32 %v312_v24, %v2097_v23  ;;  %v554_v30 = vsel %vm29_vm0, %v488_v25, 0.0  ;;  %v551_v33 = vsel %vm29_vm0, %v487_v29, 0.0  ;;  %v453_v34 = vsel %vm389_vm3, %v357_v12, %v421_v27  ;;  %v300_v53 = vpop.permute.xlu0 %299 }
 0x14e   :  { %555 = vadd.xlane.f32.xlu1 %v554_v30  ;;  %vm390_vm6 = vcmp.gt.f32.partialorder %v358_v18, 0.0  ;;  %v360_v35 = vadd.f32 %v312_v24, %v2094_v19  ;;  %552 = vadd.xlane.f32.xlu0 %v551_v33  ;;  %v436_v37 = vsel %vm372_vm4, %v340_v21, %v404_v31  ;;  %v435_v38 = vsel %vm371_vm5, %v339_v20, %v403_v32 }
 0x14f   :  { %v422_v39 = vmul.f32 0.2, %v358_v18  ;;  %v472_v41 = vmul.f32 %v2152_v10, %v436_v37  ;;  %v471_v42 = vmul.f32 %v2152_v10, %v435_v38  ;;  %v489_v43 = vmul.f32 %v2152_v10, %v453_v34 }
 0x150   :  { %v316_v36 = vpop.permute.xlu1 %315  ;;  %vm391_vm7 = vcmp.gt.f32.partialorder %v359_v28, 0.0  ;;  %v423_v45 = vmul.f32 0.2, %v359_v28  ;;  %vm392_vm8 = vcmp.gt.f32.partialorder %v360_v35, 0.0  ;;  %v424_v52 = vmul.f32 0.2, %v360_v35 }
 0x151   :  { %v363_v40 = vadd.f32 %v316_v36, %v2097_v23  ;;  %v454_v44 = vsel %vm390_vm6, %v358_v18, %v422_v39  ;;  %v364_v46 = vadd.f32 %v316_v36, %v2094_v19  ;;  %v506_v47 = vsel %vm29_vm0, %v472_v41, 0.0  ;;  %v298_v14 = vpop.permute.xlu0 %297 }
 0x152   :  { %v503_v48 = vsel %vm29_vm0, %v471_v42, 0.0  ;;  %507 = vadd.xlane.f32.xlu0 %v506_v47  ;;  %v490_v50 = vmul.f32 %v2152_v10, %v454_v44  ;;  %v455_v51 = vsel %vm391_vm7, %v359_v28, %v423_v45  ;;  %v557_v56 = vsel %vm29_vm0, %v489_v43, 0.0 }
 0x153   :  { %504 = vadd.xlane.f32.xlu1 %v503_v48  ;;  %vm395_vm9 = vcmp.gt.f32.partialorder %v363_v40, 0.0  ;;  %v456_v57 = vsel %vm392_vm8, %v360_v35, %v424_v52  ;;  %v427_v58 = vmul.f32 0.2, %v363_v40  ;;  %v491_v60 = vmul.f32 %v2152_v10, %v455_v51 }
 0x154   :  { %v294_v49 = vpop.permute.xlu1 %293  ;;  %v560_v59 = vsel %vm29_vm0, %v490_v50, 0.0  ;;  %v492_v61 = vmul.f32 %v2152_v10, %v456_v57  ;;  %vm396_vm10 = vcmp.gt.f32.partialorder %v364_v46, 0.0  ;;  %v428_v0 = vmul.f32 0.2, %v364_v46 }
 0x155   :  { %v341_v54 = vadd.f32 %v294_v49, %v2097_v23  ;;  %v342_v55 = vadd.f32 %v294_v49, %v2094_v19  ;;  %v459_v63 = vsel %vm395_vm9, %v363_v40, %v427_v58  ;;  %v563_v15 = vsel %vm29_vm0, %v491_v60, 0.0  ;;  %v302_v38 = vpop.permute.xlu0 %301 }
 0x156   :  { %558 = vadd.xlane.f32.xlu0 %v557_v56  ;;  %v495_v9 = vmul.f32 %v2152_v10, %v459_v63  ;;  %v460_v11 = vsel %vm396_vm10, %v364_v46, %v428_v0  ;;  %v566_v16 = vsel %vm29_vm0, %v492_v61, 0.0  ;;  %v347_v21 = vadd.f32 %v300_v53, %v2097_v23 }
 0x157   :  { %561 = vadd.xlane.f32.xlu1 %v560_v59  ;;  %vm373_vm11 = vcmp.gt.f32.partialorder %v341_v54, 0.0  ;;  %v405_v1 = vmul.f32 0.2, %v341_v54  ;;  %vm374_vm12 = vcmp.gt.f32.partialorder %v342_v55, 0.0  ;;  %v406_v12 = vmul.f32 0.2, %v342_v55 }
 0x158   :  { %v296_v62 = vpop.permute.xlu1 %295  ;;  %v496_v18 = vmul.f32 %v2152_v10, %v460_v11  ;;  %v348_v26 = vadd.f32 %v300_v53, %v2094_v19  ;;  %v575_v27 = vsel %vm29_vm0, %v495_v9, 0.0  ;;  %v411_v37 = vmul.f32 0.2, %v347_v21 }
 0x159   :  { %v343_v4 = vadd.f32 %v296_v62, %v2097_v23  ;;  %v344_v7 = vadd.f32 %v296_v62, %v2094_v19  ;;  %v437_v20 = vsel %vm373_vm11, %v341_v54, %v405_v1  ;;  %v438_v24 = vsel %vm374_vm12, %v342_v55, %v406_v12  ;;  %v304_v53 = vpop.permute.xlu0 %303 }
 0x15a   :  { %564 = vadd.xlane.f32.xlu0 %v563_v15  ;;  %v473_v28 = vmul.f32 %v2152_v10, %v437_v20  ;;  %v578_v31 = vsel %vm29_vm0, %v496_v18, 0.0  ;;  %v474_v32 = vmul.f32 %v2152_v10, %v438_v24  ;;  %vm379_vm15 = vcmp.gt.f32.partialorder %v347_v21, 0.0 }
 0x15b   :  { %567 = vadd.xlane.f32.xlu1 %v566_v16  ;;  %vm375_vm13 = vcmp.gt.f32.partialorder %v343_v4, 0.0  ;;  %v407_v25 = vmul.f32 0.2, %v343_v4  ;;  %vm376_vm14 = vcmp.gt.f32.partialorder %v344_v7, 0.0  ;;  %v408_v29 = vmul.f32 0.2, %v344_v7 }
 0x15c   :  { %v314_v22 = vpop.permute.xlu1 %313  ;;  %vm380_vm1 = vcmp.gt.f32.partialorder %v348_v26, 0.0  ;;  %v509_v39 = vsel %vm29_vm0, %v473_v28, 0.0  ;;  %v412_v42 = vmul.f32 0.2, %v348_v26  ;;  %v512_v45 = vsel %vm29_vm0, %v474_v32, 0.0 }
 0x15d   :  { %v361_v30 = vadd.f32 %v314_v22, %v2097_v23  ;;  %v439_v33 = vsel %vm375_vm13, %v343_v4, %v407_v25  ;;  %v362_v34 = vadd.f32 %v314_v22, %v2094_v19  ;;  %v440_v36 = vsel %vm376_vm14, %v344_v7, %v408_v29  ;;  %v322_v16 = vpop.permute.xlu0 %321 }
 0x15e   :  { %576 = vadd.xlane.f32.xlu0 %v575_v27  ;;  %v475_v40 = vmul.f32 %v2152_v10, %v439_v33  ;;  %v476_v41 = vmul.f32 %v2152_v10, %v440_v36  ;;  %v443_v48 = vsel %vm379_vm15, %v347_v21, %v411_v37  ;;  %v444_v49 = vsel %vm380_vm1, %v348_v26, %v412_v42 }
 0x15f   :  { %579 = vadd.xlane.f32.xlu1 %v578_v31  ;;  %v425_v46 = vmul.f32 0.2, %v361_v30  ;;  %vm393_vm2 = vcmp.gt.f32.partialorder %v361_v30, 0.0  ;;  %v426_v50 = vmul.f32 0.2, %v362_v34  ;;  %vm394_vm3 = vcmp.gt.f32.partialorder %v362_v34, 0.0 }
 0x160   :  { %v318_v35 = vpop.permute.xlu1 %317  ;;  %v515_v51 = vsel %vm29_vm0, %v475_v40, 0.0  ;;  %v518_v52 = vsel %vm29_vm0, %v476_v41, 0.0  ;;  %v479_v55 = vmul.f32 %v2152_v10, %v443_v48  ;;  %v480_v56 = vmul.f32 %v2152_v10, %v444_v49 }
 0x161   :  { %v365_v43 = vadd.f32 %v318_v35, %v2097_v23  ;;  %v366_v44 = vadd.f32 %v318_v35, %v2094_v19  ;;  %v457_v57 = vsel %vm393_vm2, %v361_v30, %v425_v46  ;;  %v458_v59 = vsel %vm394_vm3, %v362_v34, %v426_v50  ;;  %v306_v31 = vpop.permute.xlu0 %305 }
 0x162   :  { %510 = vadd.xlane.f32.xlu0 %v509_v39  ;;  %v345_v62 = vadd.f32 %v298_v14, %v2097_v23  ;;  %v346_v63 = vadd.f32 %v298_v14, %v2094_v19  ;;  %v527_v0 = vsel %vm29_vm0, %v479_v55, 0.0  ;;  %v530_v1 = vsel %vm29_vm0, %v480_v56, 0.0 }
 0x163   :  { %513 = vadd.xlane.f32.xlu1 %v512_v45  ;;  %v429_v60 = vmul.f32 0.2, %v365_v43  ;;  %v430_v61 = vmul.f32 0.2, %v366_v44  ;;  %vm397_vm4 = vcmp.gt.f32.partialorder %v365_v43, 0.0  ;;  %vm398_vm5 = vcmp.gt.f32.partialorder %v366_v44, 0.0 }
 0x164   :  { %v320_v47 = vpop.permute.xlu1 %319  ;;  %v493_v4 = vmul.f32 %v2152_v10, %v457_v57  ;;  %v494_v7 = vmul.f32 %v2152_v10, %v458_v59  ;;  %v349_v18 = vadd.f32 %v302_v38, %v2097_v23  ;;  %v350_v14 = vadd.f32 %v302_v38, %v2094_v19 }
 0x165   :  { %v367_v54 = vadd.f32 %v320_v47, %v2097_v23  ;;  %v368_v58 = vadd.f32 %v320_v47, %v2094_v19  ;;  %v461_v12 = vsel %vm397_vm4, %v365_v43, %v429_v60  ;;  %v462_v15 = vsel %vm398_vm5, %v366_v44, %v430_v61 }
 0x166   :  { %516 = vadd.xlane.f32.xlu0 %v515_v51  ;;  %v569_v20 = vsel %vm29_vm0, %v493_v4, 0.0  ;;  %v572_v21 = vsel %vm29_vm0, %v494_v7, 0.0  ;;  %v497_v22 = vmul.f32 %v2152_v10, %v461_v12  ;;  %v498_v24 = vmul.f32 %v2152_v10, %v462_v15 }
 0x167   :  { %519 = vadd.xlane.f32.xlu1 %v518_v52  ;;  %v431_v9 = vmul.f32 0.2, %v367_v54  ;;  %v432_v11 = vmul.f32 0.2, %v368_v58  ;;  %vm399_vm6 = vcmp.gt.f32.partialorder %v367_v54, 0.0  ;;  %vm400_vm7 = vcmp.gt.f32.partialorder %v368_v58, 0.0 }
 0x168   :  { %v409_v27 = vmul.f32 0.2, %v345_v62  ;;  %v410_v28 = vmul.f32 0.2, %v346_v63  ;;  %vm377_vm8 = vcmp.gt.f32.partialorder %v345_v62, 0.0  ;;  %vm378_vm9 = vcmp.gt.f32.partialorder %v346_v63, 0.0 }
 0x169   :  { %v463_v25 = vsel %vm399_vm6, %v367_v54, %v431_v9  ;;  %v464_v26 = vsel %vm400_vm7, %v368_v58, %v432_v11  ;;  %v351_v29 = vadd.f32 %v304_v53, %v2097_v23  ;;  %v352_v30 = vadd.f32 %v304_v53, %v2094_v19 }
 0x16a   :  { %528 = vadd.xlane.f32.xlu0 %v527_v0  ;;  %v581_v32 = vsel %vm29_vm0, %v497_v22, 0.0  ;;  %v584_v33 = vsel %vm29_vm0, %v498_v24, 0.0  ;;  %v499_v34 = vmul.f32 %v2152_v10, %v463_v25  ;;  %v500_v35 = vmul.f32 %v2152_v10, %v464_v26 }
 0x16b   :  { %531 = vadd.xlane.f32.xlu1 %v530_v1  ;;  %v441_v36 = vsel %vm377_vm8, %v345_v62, %v409_v27  ;;  %v442_v37 = vsel %vm378_vm9, %v346_v63, %v410_v28  ;;  %v413_v38 = vmul.f32 0.2, %v349_v18  ;;  %v414_v39 = vmul.f32 0.2, %v350_v14 }
 0x16c   :  { %vm381_vm10 = vcmp.gt.f32.partialorder %v349_v18, 0.0  ;;  %vm382_vm11 = vcmp.gt.f32.partialorder %v350_v14, 0.0  ;;  %v353_v40 = vadd.f32 %v306_v31, %v2097_v23  ;;  %v354_v41 = vadd.f32 %v306_v31, %v2094_v19 }
 0x16d   :  { %v587_v42 = vsel %vm29_vm0, %v499_v34, 0.0  ;;  %v590_v43 = vsel %vm29_vm0, %v500_v35, 0.0  ;;  %v477_v44 = vmul.f32 %v2152_v10, %v441_v36  ;;  %v478_v45 = vmul.f32 %v2152_v10, %v442_v37 }
 0x16e   :  { %570 = vadd.xlane.f32.xlu0 %v569_v20  ;;  %v445_v46 = vsel %vm381_vm10, %v349_v18, %v413_v38  ;;  %v446_v47 = vsel %vm382_vm11, %v350_v14, %v414_v39  ;;  %v415_v48 = vmul.f32 0.2, %v351_v29  ;;  %v416_v49 = vmul.f32 0.2, %v352_v30 }
 0x16f   :  { %573 = vadd.xlane.f32.xlu1 %v572_v21  ;;  %vm383_vm12 = vcmp.gt.f32.partialorder %v351_v29, 0.0  ;;  %vm384_vm13 = vcmp.gt.f32.partialorder %v352_v30, 0.0  ;;  %v369_v50 = vadd.f32 %v322_v16, %v2097_v23  ;;  %v370_v51 = vadd.f32 %v322_v16, %v2094_v19 }
 0x170   :  { %v521_v52 = vsel %vm29_vm0, %v477_v44, 0.0  ;;  %v524_v53 = vsel %vm29_vm0, %v478_v45, 0.0  ;;  %v481_v54 = vmul.f32 %v2152_v10, %v445_v46  ;;  %v482_v55 = vmul.f32 %v2152_v10, %v446_v47 }
 0x171   :  { %v447_v56 = vsel %vm383_vm12, %v351_v29, %v415_v48  ;;  %v448_v57 = vsel %vm384_vm13, %v352_v30, %v416_v49  ;;  %v417_v58 = vmul.f32 0.2, %v353_v40  ;;  %v418_v59 = vmul.f32 0.2, %v354_v41 }
 0x172   :  { %582 = vadd.xlane.f32.xlu0 %v581_v32  ;;  %vm385_vm14 = vcmp.gt.f32.partialorder %v353_v40, 0.0  ;;  %vm386_vm15 = vcmp.gt.f32.partialorder %v354_v41, 0.0  ;;  %v533_v23 = vsel %vm29_vm0, %v481_v54, 0.0  ;;  %v536_v19 = vsel %vm29_vm0, %v482_v55, 0.0 }
 0x173   :  { %585 = vadd.xlane.f32.xlu1 %v584_v33  ;;  %v483_v60 = vmul.f32 %v2152_v10, %v447_v56  ;;  %v484_v61 = vmul.f32 %v2152_v10, %v448_v57  ;;  %v449_v62 = vsel %vm385_vm14, %v353_v40, %v417_v58  ;;  %v450_v63 = vsel %vm386_vm15, %v354_v41, %v418_v59 }
 0x174   :  { %v433_v0 = vmul.f32 0.2, %v369_v50  ;;  %v434_v1 = vmul.f32 0.2, %v370_v51  ;;  %vm401_vm1 = vcmp.gt.f32.partialorder %v369_v50, 0.0  ;;  %vm402_vm2 = vcmp.gt.f32.partialorder %v370_v51, 0.0 }
 0x175   :  { %v539_v4 = vsel %vm29_vm0, %v483_v60, 0.0  ;;  %v542_v7 = vsel %vm29_vm0, %v484_v61, 0.0  ;;  %v485_v9 = vmul.f32 %v2152_v10, %v449_v62  ;;  %v486_v11 = vmul.f32 %v2152_v10, %v450_v63 }
 0x176   :  { %588 = vadd.xlane.f32.xlu0 %v587_v42  ;;  %v465_v12 = vsel %vm401_vm1, %v369_v50, %v433_v0  ;;  %v466_v15 = vsel %vm402_vm2, %v370_v51, %v434_v1  ;;  %v632_v41 = vand.u32 127, %v111_v2  ;;  %vm642_vm3 = vcmask 130112  }
 0x177   :  { %591 = vadd.xlane.f32.xlu1 %v590_v43  ;;  %v545_v16 = vsel %vm29_vm0, %v485_v9, 0.0  ;;  %v548_v18 = vsel %vm29_vm0, %v486_v11, 0.0  ;;  %v501_v14 = vmul.f32 %v2152_v10, %v465_v12  ;;  %v502_v20 = vmul.f32 %v2152_v10, %v466_v15 }
 0x178   :  { %v637_v44 = vadd.s32 4294967288, %v632_v41  ;;  %v2270_v47 = vsub.s32 %v632_v41, %v2067_v5  ;;  %vm779_vm4 = vcmask 1041409   ;;  %vm781_vm5 = vcmask 1042434  }
 0x179   :  { %v593_v21 = vsel %vm29_vm0, %v501_v14, 0.0  ;;  %v596_v22 = vsel %vm29_vm0, %v502_v20, 0.0  ;;  %vm783_vm6 = vcmask 1043459   ;;  %vm785_vm7 = vcmask 1044484  }
 0x17a   :  { %522 = vadd.xlane.f32.xlu0 %v521_v52  ;;  %v2273_v48 = vsub.s32 %v637_v44, %v2067_v5  ;;  %vm787_vm8 = vcmask 1045509   ;;  %vm791_vm9 = vcmask 1047559   ;;  %vm789_vm11 = vcmask 1046534  }
 0x17b   :  { %525 = vadd.xlane.f32.xlu1 %v524_v53  ;;  %vm2699_vm12 = vcmask 130048  }
 0x17e   :  { %534 = vadd.xlane.f32.xlu0 %v533_v23 }
 0x17f   :  { %537 = vadd.xlane.f32.xlu1 %v536_v19 }
 0x182   :  { %540 = vadd.xlane.f32.xlu0 %v539_v4 }
 0x183   :  { %543 = vadd.xlane.f32.xlu1 %v542_v7 }
 0x186   :  { %546 = vadd.xlane.f32.xlu0 %v545_v16 }
 0x187   :  { %549 = vadd.xlane.f32.xlu1 %v548_v18 }
 0x18a   :  { %594 = vadd.xlane.f32.xlu0 %v593_v21 }
 0x18b   :  { %597 = vadd.xlane.f32.xlu1 %v596_v22 }
 0x1d7   :  { %v556_v24 = vpop.xlane.xlu1 %555  ;;  %v553_v25 = vpop.xlane.xlu0 %552 }
 0x1d8   :  { %v714_v23 = vrot.slane %v556_v24, %v2273_v48  ;;  %v710_v19 = vrot.slane %v553_v25, %v2270_v47 }
 0x1da   :  { %v715_v18 = vsel %vm642_vm3, %v714_v23, %v710_v19 }
 0x1db   :  { %v508_v26 = vpop.xlane.xlu0 %507 }
 0x1dc   :  { %v505_v27 = vpop.xlane.xlu1 %504  ;;  %v641_v49 = vrot.slane %v508_v26, %v2273_v48 }
 0x1dd   :  { %v636_v50 = vrot.slane %v505_v27, %v2270_v47 }
 0x1df   :  { %v559_v28 = vpop.xlane.xlu0 %558  ;;  %v643_v62 = vsel %vm642_vm3, %v641_v49, %v636_v50 }
 0x1e0   :  { %v562_v29 = vpop.xlane.xlu1 %561  ;;  %v719_v52 = vrot.slane %v559_v28, %v2270_v47 }
 0x1e1   :  { %v723_v53 = vrot.slane %v562_v29, %v2273_v48 }
 0x1e3   :  { %v2248_v30 = vpop.xlane.xlu0 %564  ;;  %v724_v63 = vsel %vm642_vm3, %v723_v53, %v719_v52  ;;  %v2346_v53 = vld [vmem:[%s2694_s1 + $0x8] sm:$0xff] }
 0x1e4   :  { %v2250_v31 = vpop.xlane.xlu1 %567  ;;  %v728_v1 = vrot.slane %v2248_v30, %v2270_v47  ;;  %v793_v25 = vsel %vm779_vm4, %v724_v63, %v715_v18  ;;  %vm2698_vm13 = vcmp.gt.f32.partialorder %v2346_v53, 0.0 }
 0x1e5   :  { %v732_v4 = vrot.slane %v2250_v31, %v2273_v48 }
 0x1e7   :  { %v2252_v32 = vpop.xlane.xlu0 %576  ;;  %v733_v29 = vsel %vm642_vm3, %v732_v4, %v728_v1 }
 0x1e8   :  { %v2254_v10 = vpop.xlane.xlu1 %579  ;;  %v746_v30 = vrot.slane %v2252_v32, %v2270_v47 }
 0x1e9   :  { %v750_v31 = vrot.slane %v2254_v10, %v2273_v48 }
 0x1eb   :  { %v511_v33 = vpop.xlane.xlu0 %510 }
 0x1ec   :  { %v514_v34 = vpop.xlane.xlu1 %513  ;;  %v647_v54 = vrot.slane %v511_v33, %v2270_v47 }
 0x1ed   :  { %v651_v55 = vrot.slane %v514_v34, %v2273_v48 }
 0x1ef   :  { %v517_v35 = vpop.xlane.xlu0 %516  ;;  %v652_v0 = vsel %vm642_vm3, %v651_v55, %v647_v54  ;;  %v751_v54 = vsel %vm642_vm3, %v750_v31, %v746_v30 }
 0x1f0   :  { %v520_v36 = vpop.xlane.xlu1 %519  ;;  %v656_v56 = vrot.slane %v517_v35, %v2270_v47  ;;  %v780_v14 = vsel %vm779_vm4, %v652_v0, %v643_v62 }
 0x1f1   :  { %v660_v57 = vrot.slane %v520_v36, %v2273_v48 }
 0x1f3   :  { %v2256_v37 = vpop.xlane.xlu0 %528  ;;  %v661_v7 = vsel %vm642_vm3, %v660_v57, %v656_v56 }
 0x1f4   :  { %v2258_v38 = vpop.xlane.xlu1 %531  ;;  %v674_v20 = vrot.slane %v2256_v37, %v2270_v47  ;;  %v782_v26 = vsel %vm781_vm5, %v661_v7, %v780_v14 }
 0x1f5   :  { %v678_v21 = vrot.slane %v2258_v38, %v2273_v48  ;;  %v2325_v38 = vld [vmem:[%s2694_s1] sm:$0xff] }
 0x1f6   :  { %vm22_vm10 = vcmp.gt.f32.partialorder %v2325_v38, 0.0 }
 0x1f7   :  { %v571_v39 = vpop.xlane.xlu0 %570  ;;  %v679_v32 = vsel %vm642_vm3, %v678_v21, %v674_v20 }
 0x1f8   :  { %v574_v40 = vpop.xlane.xlu1 %573  ;;  %v737_v9 = vrot.slane %v571_v39, %v2270_v47 }
 0x1f9   :  { %v741_v11 = vrot.slane %v574_v40, %v2273_v48 }
 0x1fb   :  { %v2261_v42 = vpop.xlane.xlu0 %582  ;;  %v742_v34 = vsel %vm642_vm3, %v741_v11, %v737_v9 }
 0x1fc   :  { %v2263_v43 = vpop.xlane.xlu1 %585  ;;  %v755_v35 = vrot.slane %v2261_v42, %v2270_v47 }
 0x1fd   :  { %v759_v36 = vrot.slane %v2263_v43, %v2273_v48  ;;  %v794_v43 = vsel %vm781_vm5, %v733_v29, %v793_v25 }
 0x1ff   :  { %v2265_v45 = vpop.xlane.xlu0 %588 }
 0x200   :  { %v2267_v46 = vpop.xlane.xlu1 %591  ;;  %v764_v10 = vrot.slane %v2265_v45, %v2270_v47 }
 0x201   :  { %v768_v39 = vrot.slane %v2267_v46, %v2273_v48  ;;  %v760_v46 = vsel %vm642_vm3, %v759_v36, %v755_v35 }
 0x203   :  { %v523_v2 = vpop.xlane.xlu0 %522  ;;  %v769_v55 = vsel %vm642_vm3, %v768_v39, %v764_v10 }
 0x204   :  { %v526_v51 = vpop.xlane.xlu1 %525  ;;  %v665_v58 = vrot.slane %v523_v2, %v2270_v47  ;;  %v795_v2 = vsel %vm783_vm6, %v742_v34, %v794_v43 }
 0x205   :  { %v669_v59 = vrot.slane %v526_v51, %v2273_v48 }
 0x207   :  { %v535_v60 = vpop.xlane.xlu0 %534  ;;  %v670_v12 = vsel %vm642_vm3, %v669_v59, %v665_v58 }
 0x208   :  { %v538_v61 = vpop.xlane.xlu1 %537  ;;  %v683_v15 = vrot.slane %v535_v60, %v2270_v47  ;;  %v784_v33 = vsel %vm783_vm6, %v670_v12, %v782_v26  ;;  %v796_v60 = vsel %vm785_vm7, %v751_v54, %v795_v2  ;;  %v2396_v2 = vld [vmem:[%s2696_s3 + $0x8] sm:$0xff] }
 0x209   :  { %v687_v16 = vrot.slane %v538_v61, %v2273_v48  ;;  %v786_v50 = vsel %vm785_vm7, %v679_v32, %v784_v33  ;;  %v797_v62 = vsel %vm787_vm8, %v760_v46, %v796_v60  ;;  %v831_v33 = vsub.s32 3, %v2067_v5 }
 0x20a   :  { %v798_v0 = vsel %vm789_vm11, %v769_v55, %v797_v62 }
 0x20b   :  { %v541_v22 = vpop.xlane.xlu0 %540  ;;  %v688_v37 = vsel %vm642_vm3, %v687_v16, %v683_v15  ;;  %v832_v34 = vrot.slane %v2072_v6, %v831_v33  ;;  %v1907_v6 = vld [vmem:[%s2695_s2 + $0x38] sm:$0xff] }
 0x20c   :  { %v544_v24 = vpop.xlane.xlu1 %543  ;;  %v692_v27 = vrot.slane %v541_v22, %v2270_v47  ;;  %v788_v45 = vsel %vm787_vm8, %v688_v37, %v786_v50  ;;  %1951 = vmatprep.subr.mxu1 %v1907_v6  ;;  %v1904_v50 = vld [vmem:[%s2695_s2 + $0x20] sm:$0xff] }
 0x20d   :  { %v696_v28 = vrot.slane %v544_v24, %v2273_v48 }
 0x20f   :  { %v697_v40 = vsel %vm642_vm3, %v696_v28, %v692_v27  ;;  %v547_v41 = vpop.xlane.xlu0 %546 }
 0x210   :  { %v550_v42 = vpop.xlane.xlu1 %549  ;;  %v701_v44 = vrot.slane %v547_v41, %v2270_v47  ;;  %v790_v52 = vsel %vm789_vm11, %v697_v40, %v788_v45  ;;  %v1056_v45 = vrot.slane %v2396_v2, %v119_v8  ;;  %v947_v8 = vsub.s32 4, %v2067_v5 }
 0x211   :  { %v705_v49 = vrot.slane %v550_v42, %v2273_v48 }
 0x213   :  { %v706_v51 = vsel %vm642_vm3, %v705_v49, %v701_v44  ;;  %v595_v56 = vpop.xlane.xlu0 %594  ;;  %v1906_v44 = vld [vmem:[%s2695_s2 + $0x30] sm:$0xff]  ;;  %v1905_v49 = vld [vmem:[%s2695_s2 + $0x28] sm:$0xff] }
 0x214   :  { %v598_v57 = vpop.xlane.xlu1 %597  ;;  %v792_v58 = vsel %vm791_vm9, %v706_v51, %v790_v52  ;;  %v773_v59 = vrot.slane %v595_v56, %v2270_v47 }
 0x215   :  { %v777_v23 = vrot.slane %v598_v57, %v2273_v48  ;;  %v802_v19 = vsel %vm22_vm10, %v792_v58, -1e+30 }
 0x216   :  { %v805_v61 = vsel %vm2699_vm12, %v802_v19, -inf }
 0x217   :  { %806 = vmax.xlane.f32.xlu0 %v805_v61  ;;  %v778_v63 = vsel %vm642_vm3, %v777_v23, %v773_v59 }
 0x218   :  { %v799_v1 = vsel %vm791_vm9, %v778_v63, %v798_v0  ;;  %v953_v63 = vsub.s32 5, %v2067_v5 }
 0x219   :  { %v803_v4 = vsel %vm2698_vm13, %v799_v1, -1e+30  ;;  %v1999_v1 = vld [vmem:[%s2696_s3] sm:$0xff]  ;;  %s2025_s3 = smov [#allocation2]  }
 0x21a   :  { %v808_v7 = vsel %vm2699_vm12, %v803_v4, -inf  ;;  %s1889_s18 = sshll.u32 %s2025_s3, 4  ;;  %s1890_s18 = int_to_ptr.vmem [resolvable:$true] %s1889_s18 }
 0x21b   :  { %809 = vmax.xlane.f32.xlu1 %v808_v7  ;;  %s2000_s19 = scalar_lea.vmem %s1890_s18, 256  ;;  %p2005_p1 = scmp.lt.s32.totalorder %s1890_s18, %s1890_s18 }
 0x21c   :  { %p2001_p0 = scmp.ne.s32.totalorder %s1890_s18, %s2000_s19  ;;  %p2006_p2 = scmp.lt.s32.totalorder %s2000_s19, %s2000_s19 }
 0x21e   :  { %p2007_p3 = por %p2006_p2, %p2005_p1 }
 0x220   :  { %p2008_p4 = pnand %p2007_p3, %p2001_p0 }
 0x2a0   :  { %v807_v9 = vpop.xlane.xlu0 %806 }
 0x2a1   :  { %v811_v11 = vsub.f32 %v802_v19, %v807_v9 }
 0x2a3   :  { %v813_v12 = vmul.f32 1.442695, %v811_v11 }
 0x2a4   :  { %v810_v15 = vpop.xlane.xlu1 %809 }
 0x2a5   :  { %1975 = vpow2.f32 %v813_v12  ;;  %v812_v16 = vsub.f32 %v803_v4, %v810_v15  ;;  %v948_v4 = vrot.slane %v1999_v1, %v947_v8  ;;  %v954_v15 = vrot.slane %v1999_v1, %v953_v63 }
 0x2a7   :  { %v815_v18 = vmul.f32 1.442695, %v812_v16 }
 0x2a9   :  { %1977 = vpow2.f32 %v815_v18 }
 0x2b2   :  { %v1976_v14 = vpop.eup %1975 }
 0x2b3   :  { %v817_v20 = vsel %vm22_vm10, %v1976_v14, 0.0 }
 0x2b4   :  { %v819_v21 = vsel %vm2699_vm12, %v817_v20, 0.0 }
 0x2b5   :  { %820 = vadd.xlane.f32.xlu0 %v819_v21 }
 0x2b6   :  { %v1978_v22 = vpop.eup %1977 }
 0x2b7   :  { %v818_v24 = vsel %vm2698_vm13, %v1978_v22, 0.0 }
 0x2b8   :  { %v822_v25 = vsel %vm2699_vm12, %v818_v24, 0.0 }
 0x2b9   :  { %823 = vadd.xlane.f32.xlu1 %v822_v25  ;;  %v1050_v25 = vrot.slane %v2396_v2, %v2087_v13 }
 0x33e   :  { %v821_v26 = vpop.xlane.xlu0 %820 }
 0x33f   :  { %1979 = vrcp.f32 %v821_v26 }
 0x342   :  { %v824_v27 = vpop.xlane.xlu1 %823 }
 0x343   :  { %1981 = vrcp.f32 %v824_v27 }
 0x34c   :  { %v1980_v28 = vpop.eup %1979 }
 0x34d   :  { %v827_v29 = vmul.f32 %v1980_v28, %v817_v20 }
 0x34f   :  { %1948 = vmatprep.mubr.msk.f32.mxu1 %vm2699_vm12, %v827_v29 }
 0x350   :  { %v1982_v30 = vpop.eup %1981 }
 0x351   :  { %v828_v31 = vmul.f32 %v1982_v30, %v818_v24 }
 0x353   :  { %1949 = vmatmul.mubr.msk.f32.vlgmr.msra.gmra.mxu1 %vm2699_vm12, %v828_v31 }
 0x354   :  { %1952 = vmatpush3.msra.mxu1 %v1907_v6 }
 0x355   :  { %1953 = vmatprep.subr.mxu1 %v1906_v44 }
 0x356   :  { %1954 = vmatpush3.msra.mxu1 %v1906_v44 }
 0x357   :  { %1955 = vmatprep.subr.mxu1 %v1905_v49 }
 0x358   :  { %1956 = vmatpush3.msra.mxu1 %v1905_v49 }
 0x359   :  { %1957 = vmatprep.subr.mxu1 %v1904_v50 }
 0x35a   :  { %1958 = vmatpush3.msra.mxu1 %v1904_v50 }
 0x413   :  { %v1950_v35 = vpop.f32.mrf.mxu1 }
 0x414   :  { %v911_v36 = vadd.f32 %v1950_v35, %v832_v34 }
 0x415   :  { %v905_v37 = vpop.f32.mrf.mxu1 }
 0x416   :  { %v906_v32 = vadd.f32 %v905_v37, %v832_v34  ;;  %v917_v10 = vsel %vm29_vm0, %v911_v36, 0.0  ;;  %v924_v39 = vmul.f32 %v911_v36, %v911_v36 }
 0x417   :  { %918 = vadd.xlane.f32.xlu1 %v917_v10 }
 0x418   :  { %v914_v40 = vsel %vm29_vm0, %v906_v32, 0.0  ;;  %v923_v41 = vmul.f32 %v906_v32, %v906_v32  ;;  %v928_v42 = vsel %vm29_vm0, %v924_v39, 0.0 }
 0x419   :  { %915 = vadd.xlane.f32.xlu0 %v914_v40 }
 0x41a   :  { %v925_v43 = vsel %vm29_vm0, %v923_v41, 0.0 }
 0x41b   :  { %929 = vadd.xlane.f32.xlu1 %v928_v42 }
 0x41d   :  { %926 = vadd.xlane.f32.xlu0 %v925_v43 }
 0x433   :  { %1058 = vrot.lane.b32.xlu0 %v1056_v45, %s2022_s29 }
 0x4a0   :  { %v919_v46 = vpop.xlane.xlu1 %918 }
 0x4a1   :  { %v922_v51 = vmul.f32 0.03125, %v919_v46 }
 0x4a2   :  { %v916_v52 = vpop.xlane.xlu0 %915 }
 0x4a3   :  { %v921_v54 = vmul.f32 0.03125, %v916_v52  ;;  %v934_v56 = vmul.f32 %v922_v51, %v922_v51  ;;  %v938_v0 = vsub.f32 %v911_v36, %v922_v51 }
 0x4a4   :  { %v930_v55 = vpop.xlane.xlu1 %929 }
 0x4a5   :  { %v932_v57 = vmul.f32 0.03125, %v930_v55  ;;  %v933_v59 = vmul.f32 %v921_v54, %v921_v54  ;;  %v937_v9 = vsub.f32 %v906_v32, %v921_v54 }
 0x4a6   :  { %v927_v58 = vpop.xlane.xlu0 %926 }
 0x4a7   :  { %v936_v23 = vsub.f32 %v932_v57, %v934_v56  ;;  %v931_v19 = vmul.f32 0.03125, %v927_v58 }
 0x4a9   :  { %v940_v60 = vadd.f32 1e-05, %v936_v23  ;;  %v935_v61 = vsub.f32 %v931_v19, %v933_v59 }
 0x4aa   :  { %v1059_v26 = vpop.permute.xlu0 %1058 }
 0x4ab   :  { %1983 = vrsqrt.f32 %v940_v60  ;;  %v939_v62 = vadd.f32 1e-05, %v935_v61 }
 0x4ad   :  { %1985 = vrsqrt.f32 %v939_v62 }
 0x4b8   :  { %v1984_v7 = vpop.eup %1983 }
 0x4b9   :  { %v944_v11 = vmul.f32 %v1984_v7, %v938_v0 }
 0x4ba   :  { %v1986_v12 = vpop.eup %1985 }
 0x4bb   :  { %v943_v16 = vmul.f32 %v1986_v12, %v937_v9  ;;  %v950_v18 = vmul.f32 %v948_v4, %v944_v11 }
 0x4bd   :  { %v949_v14 = vmul.f32 %v948_v4, %v943_v16  ;;  %v956_v20 = vadd.f32 %v954_v15, %v950_v18 }
 0x4bf   :  { %v955_v21 = vadd.f32 %v954_v15, %v949_v14  ;;  %v958_v24 = vmax.f32 %v956_v20, 0.0 }
 0x4c1   :  { %v957_v22 = vmax.f32 %v955_v21, 0.0 }
 0x4c3   :  { %1959 = vmatprep.mubr.msk.f32.mxu1 %vm29_vm0, %v957_v22 }
 0x4c4   :  { %1960 = vmatmul.mubr.msk.f32.vlgmr.msra.gmra.mxu1 %vm29_vm0, %v958_v24 }
 0x584   :  { %v1961_v27 = vpop.f32.mrf.mxu1 }
 0x585   :  { %v2415_v28 = vadd.f32 %v1961_v27, %v1050_v25  ;;  %v1062_v29 = vadd.f32 %v1961_v27, %v1059_v26 }
 0x586   :  { %v1038_v30 = vpop.f32.mrf.mxu1 }
 0x587   :  { %v1121_v31 = vrot.slane %v1062_v29, %v2092_v17  ;;  %v2418_v34 = vadd.f32 %v1050_v25, %v1038_v30  ;;  %v1061_v35 = vadd.f32 %v1059_v26, %v1038_v30  ;;  %1962 = vmatprep.subr.mxu0 %v2415_v28  ;;  %v1114_v36 = vcombine.high %v1062_v29, %v1062_v29 }
 0x588   :  { %1963 = vmatpush3.msra.mxu0 %v2415_v28 }
 0x589   :  { %v1129_v37 = vcombine.high %v1121_v31, %v1121_v31  ;;  %v1137_v32 = vrot.slane %v1121_v31, %v2092_v17  ;;  %1964 = vmatprep.subr.mxu0 %v2418_v34  ;;  %v1072_v10 = vrot.slane %v1061_v35, %v2092_v17  ;;  %v1065_v39 = vcombine.high %v1061_v35, %v1061_v35 }
 0x58a   :  { %1965 = vmatpush3.msra.mxu0 %v2418_v34  ;;  %v1128_v6 = vrot.slane %v1114_v36, %v2092_v17  ;;  %v2474_v31 = vrot.slane %v2396_v2, %v469_v3 }
 0x58b   :  { %v1198_v40 = vrot.slane %v1137_v32, %v2087_v13  ;;  %v1151_v41 = vrot.slane %v1129_v37, %v2092_v17  ;;  %v1080_v42 = vcombine.high %v1072_v10, %v1072_v10  ;;  %v1088_v43 = vrot.slane %v1072_v10, %v2092_v17 }
 0x58c   :  { %v1159_v49 = vcombine.high %v1137_v32, %v1137_v32  ;;  %v1079_v50 = vrot.slane %v1065_v39, %v2092_v17  ;;  %v1144_v52 = vrot.slane %v1128_v6, %v2092_v17  ;;  %v1130_v19 = vcombine.high %v1128_v6, %v1128_v6 }
 0x58d   :  { %1243 = vrot.lane.b32.xlu1 %v1198_v40, %s2024_s0  ;;  %v1202_v44 = vrot.slane %v1151_v41, %v2087_v13  ;;  %v1166_v45 = vrot.slane %v1088_v43, %v2087_v13  ;;  %v1102_v46 = vrot.slane %v1080_v42, %v2092_v17  ;;  %v1110_v57 = vcombine.high %v1088_v43, %v1088_v43 }
 0x58e   :  { %v1206_v51 = vrot.slane %v1159_v49, %v2087_v13  ;;  %v1095_v55 = vrot.slane %v1079_v50, %v2092_v17  ;;  %v1214_v56 = vrot.slane %v1144_v52, %v2087_v13  ;;  %v1081_v58 = vcombine.high %v1079_v50, %v1079_v50 }
 0x58f   :  { %1245 = vrot.lane.b32.xlu0 %v1202_v44, %s2024_s0  ;;  %v1170_v54 = vrot.slane %v1102_v46, %v2087_v13  ;;  %v1112_v23 = vcombine.high %v1102_v46, %v1102_v46  ;;  %v1174_v60 = vrot.slane %v1110_v57, %v2087_v13  ;;  %v1161_v61 = vcombine.high %v1151_v41, %v1151_v41 }
 0x590   :  { %v1182_v59 = vrot.slane %v1095_v55, %v2087_v13  ;;  %v1109_v0 = vrot.slane %v1081_v58, %v2092_v17  ;;  %v1158_v4 = vrot.slane %v1130_v19, %v2092_v17  ;;  %v1111_v9 = vcombine.high %v1095_v55, %v1095_v55 }
 0x591   :  { %1227 = vrot.lane.b32.xlu1 %v1166_v45, %s2024_s0  ;;  %v1178_v62 = vrot.slane %v1112_v23, %v2087_v13  ;;  %v1210_v1 = vrot.slane %v1161_v61, %v2087_v13  ;;  %v1160_v12 = vcombine.high %v1144_v52, %v1144_v52 }
 0x592   :  { %v1186_v7 = vrot.slane %v1109_v0, %v2087_v13  ;;  %v1218_v11 = vrot.slane %v1158_v4, %v2087_v13  ;;  %v1190_v15 = vrot.slane %v1111_v9, %v2087_v13  ;;  %v1162_v16 = vcombine.high %v1158_v4, %v1158_v4 }
 0x593   :  { %1247 = vrot.lane.b32.xlu0 %v1206_v51, %s2024_s0  ;;  %v1222_v18 = vrot.slane %v1160_v12, %v2087_v13  ;;  %v1113_v14 = vcombine.high %v1109_v0, %v1109_v0 }
 0x594   :  { %v1226_v17 = vrot.slane %v1162_v16, %v2087_v13 }
 0x595   :  { %1229 = vrot.lane.b32.xlu1 %v1170_v54, %s2024_s0  ;;  %v1194_v20 = vrot.slane %v1113_v14, %v2087_v13 }
 0x597   :  { %1251 = vrot.lane.b32.xlu0 %v1214_v56, %s2024_s0 }
 0x599   :  { %1235 = vrot.lane.b32.xlu1 %v1182_v59, %s2024_s0 }
 0x59b   :  { %1231 = vrot.lane.b32.xlu0 %v1174_v60, %s2024_s0 }
 0x59d   :  { %1233 = vrot.lane.b32.xlu1 %v1178_v62, %s2024_s0 }
 0x59f   :  { %1249 = vrot.lane.b32.xlu0 %v1210_v1, %s2024_s0 }
 0x5a1   :  { %1237 = vrot.lane.b32.xlu1 %v1186_v7, %s2024_s0 }
 0x5a3   :  { %1253 = vrot.lane.b32.xlu0 %v1218_v11, %s2024_s0 }
 0x5a5   :  { %1239 = vrot.lane.b32.xlu1 %v1190_v15, %s2024_s0 }
 0x5a7   :  { %1255 = vrot.lane.b32.xlu0 %v1222_v18, %s2024_s0 }
 0x5a9   :  { %1257 = vrot.lane.b32.xlu1 %v1226_v17, %s2024_s0 }
 0x5ad   :  { %1241 = vrot.lane.b32.xlu1 %v1194_v20, %s2024_s0 }
 0x5ff   :  { %v1244_v21 = vpop.permute.xlu1 %1243 }
 0x600   :  { %v1291_v22 = vadd.f32 %v1244_v21, %v2418_v34  ;;  %v1292_v24 = vadd.f32 %v1244_v21, %v2415_v28 }
 0x601   :  { %v1246_v25 = vpop.permute.xlu0 %1245 }
 0x602   :  { %v1355_v26 = vmul.f32 0.2, %v1291_v22  ;;  %v1356_v27 = vmul.f32 0.2, %v1292_v24  ;;  %v1293_v29 = vadd.f32 %v1246_v25, %v2418_v34  ;;  %v1294_v30 = vadd.f32 %v1246_v25, %v2415_v28 }
 0x603   :  { %v1228_v13 = vpop.permute.xlu1 %1227  ;;  %vm1324_vm14 = vcmp.gt.f32.partialorder %v1292_v24, 0.0  ;;  %vm1323_vm15 = vcmp.gt.f32.partialorder %v1291_v22, 0.0 }
 0x604   :  { %v1275_v35 = vadd.f32 %v1228_v13, %v2418_v34  ;;  %v1276_v36 = vadd.f32 %v1228_v13, %v2415_v28  ;;  %v1357_v37 = vmul.f32 0.2, %v1293_v29  ;;  %v1388_v10 = vsel %vm1324_vm14, %v1292_v24, %v1356_v27 }
 0x605   :  { %v1248_v32 = vpop.permute.xlu0 %1247  ;;  %v1387_v39 = vsel %vm1323_vm15, %v1291_v22, %v1355_v26  ;;  %v1358_v40 = vmul.f32 0.2, %v1294_v30  ;;  %v1424_v43 = vmul.f32 %v2474_v31, %v1388_v10  ;;  %vm1326_vm13 = vcmp.gt.f32.partialorder %v1294_v30, 0.0 }
 0x606   :  { %v1339_v41 = vmul.f32 0.2, %v1275_v35  ;;  %v1340_v42 = vmul.f32 0.2, %v1276_v36  ;;  %v1423_v6 = vmul.f32 %v2474_v31, %v1387_v39  ;;  %vm1307_vm1 = vcmp.gt.f32.partialorder %v1275_v35, 0.0 }
 0x607   :  { %vm1308_vm2 = vcmp.gt.f32.partialorder %v1276_v36, 0.0  ;;  %v1295_v3 = vadd.f32 %v1248_v32, %v2418_v34  ;;  %v1296_v44 = vadd.f32 %v1248_v32, %v2415_v28  ;;  %vm1325_vm12 = vcmp.gt.f32.partialorder %v1293_v29, 0.0  ;;  %v1230_v49 = vpop.permute.xlu1 %1229 }
 0x608   :  { %v1490_v50 = vsel %vm29_vm0, %v1424_v43, 0.0  ;;  %v1487_v45 = vsel %vm29_vm0, %v1423_v6, 0.0  ;;  %v1371_v51 = vsel %vm1307_vm1, %v1275_v35, %v1339_v41  ;;  %v1372_v52 = vsel %vm1308_vm2, %v1276_v36, %v1340_v42 }
 0x609   :  { %v1252_v46 = vpop.permute.xlu0 %1251  ;;  %1491 = vadd.xlane.f32.xlu0 %v1490_v50  ;;  %1488 = vadd.xlane.f32.xlu1 %v1487_v45  ;;  %v1407_v55 = vmul.f32 %v2474_v31, %v1371_v51  ;;  %v1408_v56 = vmul.f32 %v2474_v31, %v1372_v52  ;;  %v1390_v57 = vsel %vm1326_vm13, %v1294_v30, %v1358_v40  ;;  %v1359_v59 = vmul.f32 0.2, %v1295_v3 }
 0x60a   :  { %v1300_v54 = vadd.f32 %v1252_v46, %v2415_v28  ;;  %v1389_v58 = vsel %vm1325_vm12, %v1293_v29, %v1357_v37  ;;  %v1360_v23 = vmul.f32 0.2, %v1296_v44  ;;  %v1299_v19 = vadd.f32 %v1252_v46, %v2418_v34 }
 0x60b   :  { %v1439_v60 = vsel %vm29_vm0, %v1407_v55, 0.0  ;;  %v1442_v61 = vsel %vm29_vm0, %v1408_v56, 0.0  ;;  %v1426_v0 = vmul.f32 %v2474_v31, %v1390_v57  ;;  %v1425_v1 = vmul.f32 %v2474_v31, %v1389_v58  ;;  %v1236_v7 = vpop.permute.xlu1 %1235 }
 0x60c   :  { %v1364_v4 = vmul.f32 0.2, %v1300_v54  ;;  %vm1328_vm14 = vcmp.gt.f32.partialorder %v1296_v44, 0.0  ;;  %vm1327_vm13 = vcmp.gt.f32.partialorder %v1295_v3, 0.0  ;;  %v1277_v9 = vadd.f32 %v1230_v49, %v2418_v34 }
 0x60d   :  { %v1232_v62 = vpop.permute.xlu0 %1231  ;;  %1440 = vadd.xlane.f32.xlu0 %v1439_v60  ;;  %1443 = vadd.xlane.f32.xlu1 %v1442_v61  ;;  %v1363_v11 = vmul.f32 0.2, %v1299_v19  ;;  %v1496_v12 = vsel %vm29_vm0, %v1426_v0, 0.0  ;;  %v1493_v15 = vsel %vm29_vm0, %v1425_v1, 0.0  ;;  %v1392_v18 = vsel %vm1328_vm14, %v1296_v44, %v1360_v23 }
 0x60e   :  { %v1391_v17 = vsel %vm1327_vm13, %v1295_v3, %v1359_v59  ;;  %vm1332_vm12 = vcmp.gt.f32.partialorder %v1300_v54, 0.0  ;;  %vm1331_vm15 = vcmp.gt.f32.partialorder %v1299_v19, 0.0  ;;  %v1279_v14 = vadd.f32 %v1232_v62, %v2418_v34 }
 0x60f   :  { %v1428_v20 = vmul.f32 %v2474_v31, %v1392_v18  ;;  %v1427_v21 = vmul.f32 %v2474_v31, %v1391_v17  ;;  %v1396_v22 = vsel %vm1332_vm12, %v1300_v54, %v1364_v4  ;;  %v1278_v24 = vadd.f32 %v1230_v49, %v2415_v28  ;;  %v2499_v26 = vpop.permute.xlu1 %1233 }
 0x610   :  { %v1341_v25 = vmul.f32 0.2, %v1277_v9  ;;  %v1432_v30 = vmul.f32 %v2474_v31, %v1396_v22  ;;  %v1395_v13 = vsel %vm1331_vm15, %v1299_v19, %v1363_v11  ;;  %v1283_v35 = vadd.f32 %v1236_v7, %v2418_v34 }
 0x611   :  { %v1250_v16 = vpop.permute.xlu0 %1249  ;;  %1497 = vadd.xlane.f32.xlu0 %v1496_v12  ;;  %1494 = vadd.xlane.f32.xlu1 %v1493_v15  ;;  %v1502_v27 = vsel %vm29_vm0, %v1428_v20, 0.0  ;;  %v1499_v29 = vsel %vm29_vm0, %v1427_v21, 0.0  ;;  %v1343_v36 = vmul.f32 0.2, %v1279_v14  ;;  %v1431_v32 = vmul.f32 %v2474_v31, %v1395_v13 }
 0x612   :  { %vm1309_vm1 = vcmp.gt.f32.partialorder %v1277_v9, 0.0  ;;  %v1342_v10 = vmul.f32 0.2, %v1278_v24  ;;  %v1280_v39 = vadd.f32 %v1232_v62, %v2415_v28  ;;  %v1514_v41 = vsel %vm29_vm0, %v1432_v30, 0.0 }
 0x613   :  { %v1373_v40 = vsel %vm1309_vm1, %v1277_v9, %v1341_v25  ;;  %v1511_v42 = vsel %vm29_vm0, %v1431_v32, 0.0  ;;  %vm1311_vm2 = vcmp.gt.f32.partialorder %v1279_v14, 0.0  ;;  %v1284_v6 = vadd.f32 %v1236_v7, %v2415_v28  ;;  %v2512_v49 = vpop.permute.xlu1 %1237 }
 0x614   :  { %v1409_v43 = vmul.f32 %v2474_v31, %v1373_v40  ;;  %v1297_v3 = vadd.f32 %v1250_v16, %v2418_v34  ;;  %v1347_v44 = vmul.f32 0.2, %v1283_v35  ;;  %v1375_v50 = vsel %vm1311_vm2, %v1279_v14, %v1343_v36 }
 0x615   :  { %1503 = vadd.xlane.f32.xlu0 %v1502_v27  ;;  %1500 = vadd.xlane.f32.xlu1 %v1499_v29  ;;  %v1254_v37 = vpop.permute.xlu0 %1253  ;;  %v1344_v45 = vmul.f32 0.2, %v1280_v39  ;;  %v1411_v51 = vmul.f32 %v2474_v31, %v1375_v50  ;;  %vm1310_vm14 = vcmp.gt.f32.partialorder %v1278_v24, 0.0  ;;  %vm1315_vm13 = vcmp.gt.f32.partialorder %v1283_v35, 0.0 }
 0x616   :  { %v1301_v46 = vadd.f32 %v1254_v37, %v2418_v34  ;;  %v1445_v54 = vsel %vm29_vm0, %v1409_v43, 0.0  ;;  %v1374_v55 = vsel %vm1310_vm14, %v1278_v24, %v1342_v10  ;;  %v1348_v56 = vmul.f32 0.2, %v1284_v6 }
 0x617   :  { %v1298_v57 = vadd.f32 %v1250_v16, %v2415_v28  ;;  %v1361_v58 = vmul.f32 0.2, %v1297_v3  ;;  %v1451_v59 = vsel %vm29_vm0, %v1411_v51, 0.0  ;;  %v1410_v23 = vmul.f32 %v2474_v31, %v1374_v55  ;;  %v2522_v1 = vpop.permute.xlu1 %1239 }
 0x618   :  { %v1379_v19 = vsel %vm1315_vm13, %v1283_v35, %v1347_v44  ;;  %vm1312_vm12 = vcmp.gt.f32.partialorder %v1280_v39, 0.0  ;;  %v1365_v60 = vmul.f32 0.2, %v1301_v46  ;;  %vm1329_vm15 = vcmp.gt.f32.partialorder %v1297_v3, 0.0 }
 0x619   :  { %1515 = vadd.xlane.f32.xlu0 %v1514_v41  ;;  %1512 = vadd.xlane.f32.xlu1 %v1511_v42  ;;  %v1256_v52 = vpop.permute.xlu0 %1255  ;;  %v1415_v62 = vmul.f32 %v2474_v31, %v1379_v19  ;;  %v1376_v0 = vsel %vm1312_vm12, %v1280_v39, %v1344_v45  ;;  %v1448_v4 = vsel %vm29_vm0, %v1410_v23, 0.0  ;;  %vm1316_vm1 = vcmp.gt.f32.partialorder %v1284_v6, 0.0 }
 0x61a   :  { %v1303_v61 = vadd.f32 %v1256_v52, %v2418_v34  ;;  %v1412_v7 = vmul.f32 %v2474_v31, %v1376_v0  ;;  %v1362_v9 = vmul.f32 0.2, %v1298_v57  ;;  %v1302_v11 = vadd.f32 %v1254_v37, %v2415_v28 }
 0x61b   :  { %v1281_v12 = vadd.f32 %v2499_v26, %v2418_v34  ;;  %v1463_v15 = vsel %vm29_vm0, %v1415_v62, 0.0  ;;  %v1393_v16 = vsel %vm1329_vm15, %v1297_v3, %v1361_v58  ;;  %v1380_v18 = vsel %vm1316_vm1, %v1284_v6, %v1348_v56  ;;  %v2534_v29 = vpop.permute.xlu1 %1257 }
 0x61c   :  { %v1367_v17 = vmul.f32 0.2, %v1303_v61  ;;  %v1429_v14 = vmul.f32 %v2474_v31, %v1393_v16  ;;  %vm1333_vm2 = vcmp.gt.f32.partialorder %v1301_v46, 0.0  ;;  %vm1330_vm14 = vcmp.gt.f32.partialorder %v1298_v57, 0.0 }
 0x61d   :  { %1446 = vadd.xlane.f32.xlu0 %v1445_v54  ;;  %1452 = vadd.xlane.f32.xlu1 %v1451_v59  ;;  %v1454_v20 = vsel %vm29_vm0, %v1412_v7, 0.0  ;;  %v1416_v21 = vmul.f32 %v2474_v31, %v1380_v18  ;;  %v1397_v22 = vsel %vm1333_vm2, %v1301_v46, %v1365_v60  ;;  %vm1335_vm13 = vcmp.gt.f32.partialorder %v1303_v61, 0.0 }
 0x61e   :  { %v1366_v24 = vmul.f32 0.2, %v1302_v11  ;;  %v1304_v25 = vadd.f32 %v1256_v52, %v2415_v28  ;;  %v1394_v27 = vsel %vm1330_vm14, %v1298_v57, %v1362_v9  ;;  %v1505_v30 = vsel %vm29_vm0, %v1429_v14, 0.0 }
 0x61f   :  { %v1433_v13 = vmul.f32 %v2474_v31, %v1397_v22  ;;  %vm1334_vm12 = vcmp.gt.f32.partialorder %v1302_v11, 0.0  ;;  %v1345_v35 = vmul.f32 0.2, %v1281_v12  ;;  %v1285_v36 = vadd.f32 %v2512_v49, %v2418_v34  ;;  %v1242_v50 = vpop.permute.xlu1 %1241 }
 0x620   :  { %v1399_v37 = vsel %vm1335_vm13, %v1303_v61, %v1367_v17  ;;  %v1466_v32 = vsel %vm29_vm0, %v1416_v21, 0.0  ;;  %v1430_v10 = vmul.f32 %v2474_v31, %v1394_v27  ;;  %vm1313_vm15 = vcmp.gt.f32.partialorder %v1281_v12, 0.0 }
 0x621   :  { %1449 = vadd.xlane.f32.xlu0 %v1448_v4  ;;  %1464 = vadd.xlane.f32.xlu1 %v1463_v15  ;;  %v1282_v39 = vadd.f32 %v2499_v26, %v2415_v28  ;;  %v1368_v40 = vmul.f32 0.2, %v1304_v25  ;;  %v1398_v41 = vsel %vm1334_vm12, %v1302_v11, %v1366_v24  ;;  %v1517_v42 = vsel %vm29_vm0, %v1433_v13, 0.0 }
 0x622   :  { %v1435_v43 = vmul.f32 %v2474_v31, %v1399_v37  ;;  %vm1336_vm1 = vcmp.gt.f32.partialorder %v1304_v25, 0.0  ;;  %v1349_v6 = vmul.f32 0.2, %v1285_v36  ;;  %v1287_v3 = vadd.f32 %v2522_v1, %v2418_v34 }
 0x623   :  { %v1377_v44 = vsel %vm1313_vm15, %v1281_v12, %v1345_v35  ;;  %v1508_v45 = vsel %vm29_vm0, %v1430_v10, 0.0  ;;  %v1434_v46 = vmul.f32 %v2474_v31, %v1398_v41  ;;  %vm1317_vm2 = vcmp.gt.f32.partialorder %v1285_v36, 0.0 }
 0x624   :  { %v1346_v26 = vmul.f32 0.2, %v1282_v39  ;;  %v1286_v51 = vadd.f32 %v2512_v49, %v2415_v28  ;;  %v1400_v52 = vsel %vm1336_vm1, %v1304_v25, %v1368_v40  ;;  %vm1314_vm14 = vcmp.gt.f32.partialorder %v1282_v39, 0.0 }
 0x625   :  { %1455 = vadd.xlane.f32.xlu0 %v1454_v20  ;;  %1506 = vadd.xlane.f32.xlu1 %v1505_v30  ;;  %v1523_v54 = vsel %vm29_vm0, %v1435_v43, 0.0  ;;  %v1413_v55 = vmul.f32 %v2474_v31, %v1377_v44  ;;  %v1351_v56 = vmul.f32 0.2, %v1287_v3  ;;  %v1289_v57 = vadd.f32 %v1242_v50, %v2418_v34 }
 0x626   :  { %v1381_v58 = vsel %vm1317_vm2, %v1285_v36, %v1349_v6  ;;  %vm1319_vm13 = vcmp.gt.f32.partialorder %v1287_v3, 0.0  ;;  %v1520_v59 = vsel %vm29_vm0, %v1434_v46, 0.0  ;;  %v1436_v23 = vmul.f32 %v2474_v31, %v1400_v52 }
 0x627   :  { %v1350_v19 = vmul.f32 0.2, %v1286_v51  ;;  %v1288_v49 = vadd.f32 %v2522_v1, %v2415_v28  ;;  %v1378_v60 = vsel %vm1314_vm14, %v1282_v39, %v1346_v26  ;;  %vm1318_vm12 = vcmp.gt.f32.partialorder %v1286_v51, 0.0 }
 0x628   :  { %v1457_v61 = vsel %vm29_vm0, %v1413_v55, 0.0  ;;  %v1417_v62 = vmul.f32 %v2474_v31, %v1381_v58  ;;  %v1305_v0 = vadd.f32 %v2534_v29, %v2418_v34  ;;  %v1353_v4 = vmul.f32 0.2, %v1289_v57 }
 0x629   :  { %1467 = vadd.xlane.f32.xlu0 %v1466_v32  ;;  %1518 = vadd.xlane.f32.xlu1 %v1517_v42  ;;  %v1383_v7 = vsel %vm1319_vm13, %v1287_v3, %v1351_v56  ;;  %vm1321_vm15 = vcmp.gt.f32.partialorder %v1289_v57, 0.0  ;;  %v1526_v9 = vsel %vm29_vm0, %v1436_v23, 0.0  ;;  %v1414_v11 = vmul.f32 %v2474_v31, %v1378_v60 }
 0x62a   :  { %v1352_v12 = vmul.f32 0.2, %v1288_v49  ;;  %v1290_v1 = vadd.f32 %v1242_v50, %v2415_v28  ;;  %v1382_v15 = vsel %vm1318_vm12, %v1286_v51, %v1350_v19  ;;  %vm1320_vm1 = vcmp.gt.f32.partialorder %v1288_v49, 0.0 }
 0x62b   :  { %v1469_v16 = vsel %vm29_vm0, %v1417_v62, 0.0  ;;  %v1419_v18 = vmul.f32 %v2474_v31, %v1383_v7  ;;  %v1369_v17 = vmul.f32 0.2, %v1305_v0  ;;  %v1385_v34 = vsel %vm1321_vm15, %v1289_v57, %v1353_v4 }
 0x62c   :  { %vm1337_vm2 = vcmp.gt.f32.partialorder %v1305_v0, 0.0  ;;  %v1460_v14 = vsel %vm29_vm0, %v1414_v11, 0.0  ;;  %v1418_v20 = vmul.f32 %v2474_v31, %v1382_v15  ;;  %v1306_v21 = vadd.f32 %v2534_v29, %v2415_v28 }
 0x62d   :  { %1509 = vadd.xlane.f32.xlu0 %v1508_v45  ;;  %1524 = vadd.xlane.f32.xlu1 %v1523_v54  ;;  %v1354_v22 = vmul.f32 0.2, %v1290_v1  ;;  %v1384_v24 = vsel %vm1320_vm1, %v1288_v49, %v1352_v12  ;;  %vm1322_vm14 = vcmp.gt.f32.partialorder %v1290_v1, 0.0  ;;  %v1475_v25 = vsel %vm29_vm0, %v1419_v18, 0.0 }
 0x62e   :  { %v1421_v27 = vmul.f32 %v2474_v31, %v1385_v34  ;;  %v1401_v30 = vsel %vm1337_vm2, %v1305_v0, %v1369_v17  ;;  %v1472_v13 = vsel %vm29_vm0, %v1418_v20, 0.0  ;;  %v1420_v35 = vmul.f32 %v2474_v31, %v1384_v24 }
 0x62f   :  { %v1370_v36 = vmul.f32 0.2, %v1306_v21  ;;  %v1386_v37 = vsel %vm1322_vm14, %v1290_v1, %v1354_v22  ;;  %vm1338_vm13 = vcmp.gt.f32.partialorder %v1306_v21, 0.0  ;;  %v1437_v29 = vmul.f32 %v2474_v31, %v1401_v30 }
 0x630   :  { %v1481_v28 = vsel %vm29_vm0, %v1421_v27, 0.0  ;;  %v1478_v32 = vsel %vm29_vm0, %v1420_v35, 0.0  ;;  %v1422_v10 = vmul.f32 %v2474_v31, %v1386_v37 }
 0x631   :  { %1521 = vadd.xlane.f32.xlu0 %v1520_v59  ;;  %1458 = vadd.xlane.f32.xlu1 %v1457_v61  ;;  %v1402_v39 = vsel %vm1338_vm13, %v1306_v21, %v1370_v36  ;;  %v1529_v40 = vsel %vm29_vm0, %v1437_v29, 0.0 }
 0x632   :  { %v1484_v41 = vsel %vm29_vm0, %v1422_v10, 0.0  ;;  %v1438_v42 = vmul.f32 %v2474_v31, %v1402_v39 }
 0x634   :  { %v1532_v43 = vsel %vm29_vm0, %v1438_v42, 0.0 }
 0x635   :  { %1527 = vadd.xlane.f32.xlu0 %v1526_v9  ;;  %1470 = vadd.xlane.f32.xlu1 %v1469_v16 }
 0x639   :  { %1461 = vadd.xlane.f32.xlu0 %v1460_v14  ;;  %1476 = vadd.xlane.f32.xlu1 %v1475_v25 }
 0x63d   :  { %1473 = vadd.xlane.f32.xlu0 %v1472_v13  ;;  %1482 = vadd.xlane.f32.xlu1 %v1481_v28 }
 0x641   :  { %1479 = vadd.xlane.f32.xlu0 %v1478_v32  ;;  %1530 = vadd.xlane.f32.xlu1 %v1529_v40 }
 0x645   :  { %1485 = vadd.xlane.f32.xlu0 %v1484_v41 }
 0x649   :  { %1533 = vadd.xlane.f32.xlu0 %v1532_v43 }
 0x692   :  { %v1492_v6 = vpop.xlane.xlu0 %1491  ;;  %v1489_v3 = vpop.xlane.xlu1 %1488 }
 0x693   :  { %v1646_v9 = vrot.slane %v1492_v6, %v2273_v48  ;;  %v1642_v15 = vrot.slane %v1489_v3, %v2270_v47 }
 0x695   :  { %v1647_v35 = vsel %vm642_vm3, %v1646_v9, %v1642_v15 }
 0x696   :  { %v1441_v44 = vpop.xlane.xlu0 %1440  ;;  %v1444_v50 = vpop.xlane.xlu1 %1443 }
 0x697   :  { %v1570_v16 = vrot.slane %v1441_v44, %v2270_v47  ;;  %v1574_v18 = vrot.slane %v1444_v50, %v2273_v48 }
 0x699   :  { %v1575_v36 = vsel %vm642_vm3, %v1574_v18, %v1570_v16 }
 0x69a   :  { %v1498_v45 = vpop.xlane.xlu0 %1497  ;;  %v1495_v46 = vpop.xlane.xlu1 %1494 }
 0x69b   :  { %v1655_v11 = vrot.slane %v1498_v45, %v2273_v48  ;;  %v1651_v12 = vrot.slane %v1495_v46, %v2270_v47 }
 0x69d   :  { %v1656_v27 = vsel %vm642_vm3, %v1655_v11, %v1651_v12 }
 0x69e   :  { %v1504_v26 = vpop.xlane.xlu0 %1503  ;;  %v1501_v51 = vpop.xlane.xlu1 %1500  ;;  %v1718_v39 = vsel %vm779_vm4, %v1656_v27, %v1647_v35 }
 0x69f   :  { %v1664_v14 = vrot.slane %v1504_v26, %v2273_v48  ;;  %v1660_v20 = vrot.slane %v1501_v51, %v2270_v47 }
 0x6a1   :  { %v1665_v28 = vsel %vm642_vm3, %v1664_v14, %v1660_v20 }
 0x6a2   :  { %v2584_v52 = vpop.xlane.xlu0 %1515  ;;  %v2586_v54 = vpop.xlane.xlu1 %1512  ;;  %v1719_v45 = vsel %vm781_vm5, %v1665_v28, %v1718_v39 }
 0x6a6   :  { %v1447_v55 = vpop.xlane.xlu0 %1446  ;;  %v1453_v56 = vpop.xlane.xlu1 %1452 }
 0x6a7   :  { %v1579_v21 = vrot.slane %v1447_v55, %v2270_v47  ;;  %v1588_v24 = vrot.slane %v1453_v56, %v2270_v47  ;;  %v1682_v55 = vrot.slane %v2584_v52, %v2273_v48 }
 0x6aa   :  { %v1450_v57 = vpop.xlane.xlu0 %1449  ;;  %v1465_v31 = vpop.xlane.xlu1 %1464 }
 0x6ab   :  { %v1583_v1 = vrot.slane %v1450_v57, %v2273_v48  ;;  %v1606_v46 = vrot.slane %v1465_v31, %v2270_v47 }
 0x6ad   :  { %v1584_v30 = vsel %vm642_vm3, %v1583_v1, %v1579_v21 }
 0x6ae   :  { %v1456_v58 = vpop.xlane.xlu0 %1455  ;;  %v1507_v59 = vpop.xlane.xlu1 %1506  ;;  %v1711_v40 = vsel %vm779_vm4, %v1584_v30, %v1575_v36  ;;  %vm2700_vm4 = vcmask 130048  }
 0x6af   :  { %v1592_v17 = vrot.slane %v1456_v58, %v2273_v48  ;;  %v1669_v3 = vrot.slane %v1507_v59, %v2270_v47  ;;  %v1678_v59 = vrot.slane %v2586_v54, %v2270_v47 }
 0x6b1   :  { %v1593_v37 = vsel %vm642_vm3, %v1592_v17, %v1588_v24  ;;  %v1683_v15 = vsel %vm642_vm3, %v1682_v55, %v1678_v59 }
 0x6b2   :  { %v1468_v23 = vpop.xlane.xlu0 %1467  ;;  %v2588_v19 = vpop.xlane.xlu1 %1518  ;;  %v1712_v6 = vsel %vm781_vm5, %v1593_v37, %v1711_v40  ;;  %vm2701_vm5 = vcmp.gt.f32.partialorder %v2346_v53, 0.0  ;;  %v1756_v53 = vrot.slane %v2396_v2, %v831_v33 }
 0x6b3   :  { %v1610_v41 = vrot.slane %v1468_v23, %v2273_v48  ;;  %v1687_v52 = vrot.slane %v2588_v19, %v2270_v47 }
 0x6b5   :  { %v1611_v23 = vsel %vm642_vm3, %v1610_v41, %v1606_v46 }
 0x6b6   :  { %v1510_v49 = vpop.xlane.xlu0 %1509  ;;  %v2590_v60 = vpop.xlane.xlu1 %1524 }
 0x6b7   :  { %v1673_v29 = vrot.slane %v1510_v49, %v2273_v48  ;;  %v1696_v54 = vrot.slane %v2590_v60, %v2270_v47 }
 0x6b9   :  { %v1674_v56 = vsel %vm642_vm3, %v1673_v29, %v1669_v3 }
 0x6ba   :  { %v1522_v61 = vpop.xlane.xlu0 %1521  ;;  %v1459_v62 = vpop.xlane.xlu1 %1458  ;;  %v1720_v9 = vsel %vm783_vm6, %v1674_v56, %v1719_v45 }
 0x6bb   :  { %v1597_v13 = vrot.slane %v1459_v62, %v2270_v47  ;;  %v1691_v57 = vrot.slane %v1522_v61, %v2273_v48 }
 0x6bd   :  { %v1692_v12 = vsel %vm642_vm3, %v1691_v57, %v1687_v52 }
 0x6be   :  { %v2592_v0 = vpop.xlane.xlu0 %1527  ;;  %v1471_v4 = vpop.xlane.xlu1 %1470 }
 0x6bf   :  { %v1615_v44 = vrot.slane %v1471_v4, %v2270_v47  ;;  %v1700_v31 = vrot.slane %v2592_v0, %v2273_v48 }
 0x6c1   :  { %v1701_v16 = vsel %vm642_vm3, %v1700_v31, %v1696_v54 }
 0x6c2   :  { %v1462_v7 = vpop.xlane.xlu0 %1461  ;;  %v1477_v34 = vpop.xlane.xlu1 %1476 }
 0x6c3   :  { %v1601_v22 = vrot.slane %v1462_v7, %v2273_v48  ;;  %v1624_v51 = vrot.slane %v1477_v34, %v2270_v47  ;;  %v1721_v34 = vsel %vm785_vm7, %v1683_v15, %v1720_v9 }
 0x6c4   :  { %v1722_v21 = vsel %vm787_vm8, %v1692_v12, %v1721_v34 }
 0x6c5   :  { %v1602_v32 = vsel %vm642_vm3, %v1601_v22, %v1597_v13 }
 0x6c6   :  { %v1474_v25 = vpop.xlane.xlu0 %1473  ;;  %v1483_v42 = vpop.xlane.xlu1 %1482  ;;  %v1713_v26 = vsel %vm783_vm6, %v1602_v32, %v1712_v6  ;;  %vm2702_vm6 = vmmov %vm2700_vm4 }
 0x6c7   :  { %v1619_v10 = vrot.slane %v1474_v25, %v2273_v48  ;;  %v1714_v4 = vsel %vm785_vm7, %v1611_v23, %v1713_v26  ;;  %v1633_v61 = vrot.slane %v1483_v42, %v2270_v47  ;;  %v1723_v25 = vsel %vm789_vm11, %v1701_v16, %v1722_v21  ;;  %vm2704_vm7 = vmmov %vm2701_vm5 }
 0x6c9   :  { %v1620_v58 = vsel %vm642_vm3, %v1619_v10, %v1615_v44 }
 0x6ca   :  { %v1480_v43 = vpop.xlane.xlu0 %1479  ;;  %v1715_v11 = vsel %vm787_vm8, %v1620_v58, %v1714_v4  ;;  %v1531_v0 = vpop.xlane.xlu1 %1530 }
 0x6cb   :  { %v1628_v50 = vrot.slane %v1480_v43, %v2273_v48  ;;  %v1705_v60 = vrot.slane %v1531_v0, %v2270_v47 }
 0x6cd   :  { %v1629_v49 = vsel %vm642_vm3, %v1628_v50, %v1624_v51 }
 0x6ce   :  { %v1486_v62 = vpop.xlane.xlu0 %1485  ;;  %v1716_v19 = vsel %vm789_vm11, %v1629_v49, %v1715_v11 }
 0x6cf   :  { %v1637_v7 = vrot.slane %v1486_v62, %v2273_v48 }
 0x6d1   :  { %v1638_v1 = vsel %vm642_vm3, %v1637_v7, %v1633_v61 }
 0x6d2   :  { %v1534_v18 = vpop.xlane.xlu0 %1533  ;;  %v1717_v17 = vsel %vm791_vm9, %v1638_v1, %v1716_v19  ;;  %v1871_v19 = vrot.slane %v2396_v2, %v947_v8 }
 0x6d3   :  { %v1709_v14 = vrot.slane %v1534_v18, %v2273_v48  ;;  %v1727_v20 = vsel %vm22_vm10, %v1717_v17, -1e+30  ;;  %v1877_v17 = vrot.slane %v2396_v2, %v953_v63 }
 0x6d4   :  { %v1729_v22 = vsel %vm2700_vm4, %v1727_v20, -inf }
 0x6d5   :  { %v1710_v24 = vsel %vm642_vm3, %v1709_v14, %v1705_v60  ;;  %1730 = vmax.xlane.f32.xlu1 %v1729_v22  ;;  %vm2703_vm3 = vmmov %vm2700_vm4 }
 0x6d6   :  { %v1724_v27 = vsel %vm791_vm9, %v1710_v24, %v1723_v25  ;;  %vm2705_vm8 = vmmov %vm2703_vm3 }
 0x6d7   :  { %v1728_v30 = vsel %vm2701_vm5, %v1724_v27, -1e+30  ;;  %vm2706_vm9 = vmmov %vm2703_vm3 }
 0x6d8   :  { %v1732_v47 = vsel %vm2702_vm6, %v1728_v30, -inf }
 0x6d9   :  { %1733 = vmax.xlane.f32.xlu0 %v1732_v47 }
 0x75e   :  { %v1731_v48 = vpop.xlane.xlu1 %1730 }
 0x75f   :  { %v1735_v13 = vsub.f32 %v1727_v20, %v1731_v48 }
 0x761   :  { %v1737_v35 = vmul.f32 1.442695, %v1735_v13 }
 0x762   :  { %v1734_v36 = vpop.xlane.xlu0 %1733 }
 0x763   :  { %1987 = vpow2.f32 %v1737_v35  ;;  %v1736_v37 = vsub.f32 %v1728_v30, %v1734_v36 }
 0x765   :  { %v1739_v28 = vmul.f32 1.442695, %v1736_v37 }
 0x767   :  { %1989 = vpow2.f32 %v1739_v28 }
 0x770   :  { %v1988_v29 = vpop.eup %1987 }
 0x771   :  { %v1741_v32 = vsel %vm22_vm10, %v1988_v29, 0.0  ;;  %vm2707_vm10 = vmmov %vm2703_vm3 }
 0x772   :  { %v1743_v10 = vsel %vm2703_vm3, %v1741_v32, 0.0 }
 0x773   :  { %1744 = vadd.xlane.f32.xlu1 %v1743_v10 }
 0x774   :  { %v1990_v39 = vpop.eup %1989 }
 0x775   :  { %v1742_v40 = vsel %vm2704_vm7, %v1990_v39, 0.0 }
 0x776   :  { %v1746_v41 = vsel %vm2705_vm8, %v1742_v40, 0.0 }
 0x777   :  { %1747 = vadd.xlane.f32.xlu0 %v1746_v41 }
 0x7fc   :  { %v1745_v42 = vpop.xlane.xlu1 %1744 }
 0x7fd   :  { %1991 = vrcp.f32 %v1745_v42 }
 0x800   :  { %v1748_v43 = vpop.xlane.xlu0 %1747 }
 0x801   :  { %1993 = vrcp.f32 %v1748_v43 }
 0x80a   :  { %v1992_v6 = vpop.eup %1991 }
 0x80b   :  { %v1751_v3 = vmul.f32 %v1992_v6, %v1741_v32 }
 0x80d   :  { %1966 = vmatprep.mubr.msk.f32.mxu0 %vm2706_vm9, %v1751_v3 }
 0x80e   :  { %v1994_v38 = vpop.eup %1993 }
 0x80f   :  { %v1752_v44 = vmul.f32 %v1994_v38, %v1742_v40 }
 0x811   :  { %1967 = vmatmul.mubr.msk.f32.vlgmr.msra.gmra.mxu0 %vm2707_vm10, %v1752_v44 }
 0x8d1   :  { %v1968_v50 = vpop.f32.mrf.mxu0 }
 0x8d2   :  { %v1835_v45 = vadd.f32 %v1968_v50, %v1756_v53 }
 0x8d3   :  { %v1829_v46 = vpop.f32.mrf.mxu0 }
 0x8d4   :  { %v1830_v26 = vadd.f32 %v1829_v46, %v1756_v53  ;;  %v1841_v51 = vsel %vm29_vm0, %v1835_v45, 0.0  ;;  %v1847_v55 = vmul.f32 %v1835_v45, %v1835_v45 }
 0x8d5   :  { %1842 = vadd.xlane.f32.xlu0 %v1841_v51 }
 0x8d6   :  { %v1838_v56 = vsel %vm29_vm0, %v1830_v26, 0.0  ;;  %v1846_v57 = vmul.f32 %v1830_v26, %v1830_v26  ;;  %v1851_v58 = vsel %vm29_vm0, %v1847_v55, 0.0 }
 0x8d7   :  { %1839 = vadd.xlane.f32.xlu1 %v1838_v56 }
 0x8d8   :  { %v1848_v59 = vsel %vm29_vm0, %v1846_v57, 0.0 }
 0x8d9   :  { %1852 = vadd.xlane.f32.xlu0 %v1851_v58 }
 0x8db   :  { %1849 = vadd.xlane.f32.xlu1 %v1848_v59 }
 0x95e   :  { %v1843_v23 = vpop.xlane.xlu0 %1842 }
 0x95f   :  { %v1845_v33 = vmul.f32 0.03125, %v1843_v23 }
 0x960   :  { %v1840_v31 = vpop.xlane.xlu1 %1839 }
 0x961   :  { %v1844_v49 = vmul.f32 0.03125, %v1840_v31  ;;  %v1857_v52 = vmul.f32 %v1845_v33, %v1845_v33  ;;  %v1861_v1 = vsub.f32 %v1835_v45, %v1845_v33 }
 0x962   :  { %v1853_v62 = vpop.xlane.xlu0 %1852 }
 0x963   :  { %v1855_v4 = vmul.f32 0.03125, %v1853_v62  ;;  %v1856_v7 = vmul.f32 %v1844_v49, %v1844_v49  ;;  %v1860_v16 = vsub.f32 %v1830_v26, %v1844_v49 }
 0x964   :  { %v1850_v61 = vpop.xlane.xlu1 %1849 }
 0x965   :  { %v1859_v9 = vsub.f32 %v1855_v4, %v1857_v52  ;;  %v1854_v54 = vmul.f32 0.03125, %v1850_v61 }
 0x967   :  { %v1863_v11 = vadd.f32 1e-05, %v1859_v9  ;;  %v1858_v0 = vsub.f32 %v1854_v54, %v1856_v7 }
 0x969   :  { %1995 = vrsqrt.f32 %v1863_v11  ;;  %v1862_v12 = vadd.f32 1e-05, %v1858_v0 }
 0x96b   :  { %1997 = vrsqrt.f32 %v1862_v12 }
 0x976   :  { %v1996_v15 = vpop.eup %1995 }
 0x977   :  { %v1867_v18 = vmul.f32 %v1996_v15, %v1861_v1 }
 0x978   :  { %v1998_v34 = vpop.eup %1997 }
 0x979   :  { %v1866_v60 = vmul.f32 %v1998_v34, %v1860_v16  ;;  %v1873_v14 = vmul.f32 %v1871_v19, %v1867_v18 }
 0x97b   :  { %v1872_v20 = vmul.f32 %v1871_v19, %v1866_v60  ;;  %v1879_v21 = vadd.f32 %v1877_v17, %v1873_v14 }
 0x97d   :  { %v1878_v22 = vadd.f32 %v1877_v17, %v1872_v20  ;;  %v1881_v24 = vmax.f32 %v1879_v21, 0.0 }
 0x97f   :  { %v1880_v25 = vmax.f32 %v1878_v22, 0.0  ;;  %1883 = vst.msk [vmem:[#allocation2 + $0x8] sm:$0xff] %vm29_vm0, %v1881_v24 }
 0x981   :  { %1882 = vst.msk [vmem:[#allocation2] sm:$0xff] %vm29_vm0, %v1880_v25 }
 0x982   :  { %2011 = shalt.err (!%p2008_p4)
}
 0x983   :  { %s2026_s20 = smov 128   ;;  %s2027_s21 = smov 8  }
 0x984   :  { %1895 = dma.vmem_to_hbm [thread:$0]  %s1890_s18, 256, %s2697_s4, [#allocation3], %s2026_s20, %s2026_s20, %s2027_s21  }
 0x985   :  { %2020 = dma.done.wait [#allocation3], 256  }
 0x986   :  { %2021 = vsyncadd [#allocation3], 4294967040 }
 0x987   :  { %1899 = vsyncpa [#allocation3], 1 }

</bundles_post_ra>
